<compile_context>
chip_gen: v5e
topology: v5e:2x2
jax: 0.10.0
libtpu: 0.0.40
codegen_flags: <defaults>
</compile_context>

<pallas_src>
from functools import partial

import jax
import jax.numpy as jnp
from jax import lax
from jax.experimental import pallas as pl
from jax.experimental.pallas import tpu as pltpu


def _lstm_recurrent_kernel(x_ref, wx_ref, wh_ref, b_ref, h_ref, c_ref,
                           *, tt, t_total):
    """Processes a chunk of `tt` timesteps per grid iteration (grid=(ceil(T/tt),))."""
    chunk = pl.program_id(0)
    Hp = h_ref.shape[-1]

    # H / C are resident output blocks (constant index_map): init at chunk 0.
    @pl.when(chunk == 0)
    def _():
        h_ref[...] = jnp.zeros_like(h_ref)
        c_ref[...] = jnp.zeros_like(c_ref)

    # Resident bf16 matmul operands, f32 bias.
    wx = wx_ref[...]          # (Dp, 4Hp)  bf16
    wh = wh_ref[...]          # (Hp, 4Hp)  bf16
    b = b_ref[...]            # (1,  4Hp)  f32

    def step(i, carry):
        H, C = carry          # f32 state
        x_t = x_ref[i]        # (Bp, Dp) bf16
        # Single fused 4-gate projection: bf16 MXU operands, f32 accumulation.
        gates = (
            jnp.dot(x_t, wx, preferred_element_type=jnp.float32)
            + jnp.dot(H.astype(jnp.bfloat16), wh,
                      preferred_element_type=jnp.float32)
            + b
        )
        # One sigmoid over the [I|F|O] slab, one tanh for C~ (all f32).
        ifo = jax.nn.sigmoid(gates[:, :3 * Hp])
        c_tilda = jnp.tanh(gates[:, 3 * Hp:])
        I = ifo[:, :Hp]
        F = ifo[:, Hp:2 * Hp]
        O = ifo[:, 2 * Hp:3 * Hp]
        C_new = F * C + I * c_tilda
        H_new = O * jnp.tanh(C_new)
        # Mask padded tail timesteps of the last chunk (keep old state).
        valid = (chunk * tt + i) < t_total
        return (jnp.where(valid, H_new, H), jnp.where(valid, C_new, C))

    H, C = lax.fori_loop(0, tt, step, (h_ref[...], c_ref[...]), unroll=True)
    h_ref[...] = H
    c_ref[...] = C


def _head_kernel(h_ref, whq_ref, bq_ref, y_ref):
    """Y = H_T @ W_hq + b_q, run once outside the recurrence."""
    y_ref[...] = (
        jnp.dot(h_ref[...].astype(jnp.bfloat16), whq_ref[...],
                preferred_element_type=jnp.float32)
        + bq_ref[...]
    )


def _round_up(x, m):
    return ((x + m - 1) // m) * m


def lstm_forward(seq, params, *, tt=32):
    """seq: (batch, time, input_size) float32.  Returns (Y, (H, C))."""
    B, T, D = seq.shape
    Hd = params["W_hi"].shape[0]
    Od = params["W_hq"].shape[1]
    f32, bf16 = jnp.float32, jnp.bfloat16

    LANE, SUB = 128, 8
    Hp = _round_up(Hd, LANE)      # hidden padded to lane multiple
    Op = _round_up(Od, LANE)      # output padded to lane multiple
    Bp = _round_up(B, SUB)        # batch padded to sublane multiple
    Dp = _round_up(D, SUB)        # input feature padded to sublane multiple
    G4 = 4 * Hp                   # concatenated gate width

    TT = min(tt, T)               # timesteps per grid iteration
    n_chunks = -(-T // TT)
    Tp = n_chunks * TT            # time padded to a whole number of chunks

    def pad2(w, r, c):
        w = w.astype(f32)
        return jnp.pad(w, ((0, r - w.shape[0]), (0, c - w.shape[1])))

    def pad1(v, n):
        v = v.astype(f32)
        return jnp.pad(v, (0, n - v.shape[0]))

    # Fused, zero-padded gate parameters in (I, F, O, C) order.  Matmul
    # operands in bf16 (f32 accumulation in-kernel); biases stay f32.
    wx = jnp.concatenate(
        [pad2(params[k], Dp, Hp) for k in ("W_xi", "W_xf", "W_xo", "W_xc")],
        axis=1).astype(bf16)                              # (Dp, 4Hp)
    wh = jnp.concatenate(
        [pad2(params[k], Hp, Hp) for k in ("W_hi", "W_hf", "W_ho", "W_hc")],
        axis=1).astype(bf16)                              # (Hp, 4Hp)
    bg = jnp.concatenate(
        [pad1(params[k], Hp) for k in ("b_i", "b_f", "b_o", "b_c")]
    ).reshape(1, G4)                                      # (1, 4Hp) f32
    whq = pad2(params["W_hq"], Hp, Op).astype(bf16)       # (Hp, Op)
    bq = pad1(params["b_q"], Op).reshape(1, Op)           # (1, Op) f32

    # Time-major, zero-padded sequence in bf16 (the only per-step HBM stream).
    seq_tbd = jnp.pad(
        jnp.transpose(seq.astype(f32), (1, 0, 2)),
        ((0, Tp - T), (0, Bp - B), (0, Dp - D))).astype(bf16)   # (Tp, Bp, Dp)

    # ---- Sequential recurrence: grid over timestep chunks. ----
    h, c = pl.pallas_call(
        partial(_lstm_recurrent_kernel, tt=TT, t_total=T),
        out_shape=(
            jax.ShapeDtypeStruct((Bp, Hp), f32),
            jax.ShapeDtypeStruct((Bp, Hp), f32),
        ),
        grid=(n_chunks,),
        in_specs=[
            pl.BlockSpec((TT, Bp, Dp), lambda ci: (ci, 0, 0)),   # seq chunk
            pl.BlockSpec((Dp, G4), lambda ci: (0, 0)),           # W_x (resident)
            pl.BlockSpec((Hp, G4), lambda ci: (0, 0)),           # W_h (resident)
            pl.BlockSpec((1, G4), lambda ci: (0, 0)),            # bias
        ],
        out_specs=(
            pl.BlockSpec((Bp, Hp), lambda ci: (0, 0)),           # H (resident)
            pl.BlockSpec((Bp, Hp), lambda ci: (0, 0)),           # C (resident)
        ),
        compiler_params=pltpu.CompilerParams(
            dimension_semantics=("arbitrary",)),
    )(seq_tbd, wx, wh, bg)

    # ---- Final linear head, applied once to H_T. ----
    y = pl.pallas_call(
        _head_kernel,
        out_shape=jax.ShapeDtypeStruct((Bp, Op), f32),
        grid=(1,),
        in_specs=[
            pl.BlockSpec((Bp, Hp), lambda i: (0, 0)),
            pl.BlockSpec((Hp, Op), lambda i: (0, 0)),
            pl.BlockSpec((1, Op), lambda i: (0, 0)),
        ],
        out_specs=pl.BlockSpec((Bp, Op), lambda i: (0, 0)),
    )(h, whq, bq)

    # Strip padding back to the PyTorch shapes.
    return y[:B, :Od], (h[:B, :Hd], c[:B, :Hd])
    # TODO(synk): for Hp >= ~1024 (especially v7x's 64 MiB VMEM) add a second
    # grid axis over the 4Hp gate-column dimension and single-buffer the
    # constant-index weight blocks instead of keeping the full W_h resident.


def init_params(key, input_size, hidden_size, output_size):
    """Deterministic xavier-normal init (matches nn.init.xavier_normal)."""
    def xavier(k, a, b):
        std = (2.0 / (a + b)) ** 0.5
        return std * jax.random.normal(k, (a, b), dtype=jnp.float32)

    keys = jax.random.split(key, 9)
    return {
        "W_xi": xavier(keys[0], input_size, hidden_size),
        "W_hi": xavier(keys[1], hidden_size, hidden_size),
        "b_i": jnp.zeros((hidden_size,), jnp.float32),
        "W_xf": xavier(keys[2], input_size, hidden_size),
        "W_hf": xavier(keys[3], hidden_size, hidden_size),
        "b_f": jnp.zeros((hidden_size,), jnp.float32),
        "W_xo": xavier(keys[4], input_size, hidden_size),
        "W_ho": xavier(keys[5], hidden_size, hidden_size),
        "b_o": jnp.zeros((hidden_size,), jnp.float32),
        "W_xc": xavier(keys[6], input_size, hidden_size),
        "W_hc": xavier(keys[7], hidden_size, hidden_size),
        "b_c": jnp.zeros((hidden_size,), jnp.float32),
        "W_hq": xavier(keys[8], hidden_size, output_size),
        "b_q": jnp.zeros((output_size,), jnp.float32),
    }


def lstm_reference(seq, p):
    """Plain-JAX f32 reference of the PyTorch forward, for sanity checking."""
    B, T, _ = seq.shape
    Hd = p["W_hi"].shape[0]
    H = jnp.zeros((B, Hd), jnp.float32)
    C = jnp.zeros((B, Hd), jnp.float32)
    for t in range(T):
        X = seq[:, t, :]
        I = jax.nn.sigmoid(X @ p["W_xi"] + H @ p["W_hi"] + p["b_i"])
        F = jax.nn.sigmoid(X @ p["W_xf"] + H @ p["W_hf"] + p["b_f"])
        O = jax.nn.sigmoid(X @ p["W_xo"] + H @ p["W_ho"] + p["b_o"])
        C_tilda = jnp.tanh(X @ p["W_xc"] + H @ p["W_hc"] + p["b_c"])
        C = F * C + I * C_tilda
        H = O * jnp.tanh(C)
    Y = H @ p["W_hq"] + p["b_q"]
    return Y, (H, C)


if __name__ == "__main__":
    input_size, hidden_size, output_size = 3, 4, 1
    batch, seq_len = 2, 8

    key = jax.random.PRNGKey(0)
    k_seq, k_params = jax.random.split(key)
    seq = jax.random.normal(k_seq, (batch, seq_len, input_size), dtype=jnp.float32)
    params = init_params(k_params, input_size, hidden_size, output_size)

    y, (h, c) = lstm_forward(seq, params)
    jax.block_until_ready((y, h, c))

    # Tolerances loosened vs. the pure-f32 version: matmul operands are bf16
    # (f32 accumulation), which shifts gate pre-activations at the ~1e-3 level.
    y_ref, (h_ref, c_ref) = lstm_reference(seq, params)
    assert jnp.allclose(y, y_ref, atol=5e-2), "Y mismatch vs reference"
    assert jnp.allclose(h, h_ref, atol=5e-2), "H mismatch vs reference"
    assert jnp.allclose(c, c_ref, atol=5e-2), "C mismatch vs reference"

    print("KERNEL_OK")
</pallas_src>

<mosaic_0001>
module attributes {stable_mosaic.version = 11 : i64} {
  func.func @_lstm_recurrent_kernel(%arg0: i32, %arg1: memref<8x8x8xbf16, #tpu.memory_space<vmem>>, %arg2: memref<8x512xbf16, #tpu.memory_space<vmem>>, %arg3: memref<128x512xbf16, #tpu.memory_space<vmem>>, %arg4: memref<1x512xf32, #tpu.memory_space<vmem>>, %arg5: memref<8x128xf32, #tpu.memory_space<vmem>>, %arg6: memref<8x128xf32, #tpu.memory_space<vmem>>) attributes {dimension_semantics = [#tpu.dimension_semantics<arbitrary>], iteration_bounds = array<i64: 1>, scalar_prefetch = 0 : i64, scratch_operands = 0 : i64, tpu.core_type = #tpu.core_type<tc>, window_params = [{transform_indices = @transform_0, window_bounds = array<i64: 8, 8, 8>}, {pipeline_mode = #tpu.pipeline_mode<synchronous>, transform_indices = @transform_1, window_bounds = array<i64: 8, 512>}, {pipeline_mode = #tpu.pipeline_mode<synchronous>, transform_indices = @transform_2, window_bounds = array<i64: 128, 512>}, {pipeline_mode = #tpu.pipeline_mode<synchronous>, transform_indices = @transform_3, window_bounds = array<i64: 1, 512>}, {pipeline_mode = #tpu.pipeline_mode<synchronous>, transform_indices = @transform_4, window_bounds = array<i64: 8, 128>}, {pipeline_mode = #tpu.pipeline_mode<synchronous>, transform_indices = @transform_5, window_bounds = array<i64: 8, 128>}]} {
    %c0_i32 = arith.constant 0 : i32
    %0 = arith.cmpi eq, %arg0, %c0_i32 : i32
    %1 = arith.extui %0 : i1 to i32
    %c0_i32_0 = arith.constant 0 : i32
    %2 = arith.cmpi ne, %1, %c0_i32_0 : i32
    scf.if %2 {
      %cst_70 = arith.constant 0.000000e+00 : f32
      %250 = vector.broadcast %cst_70 : f32 to vector<8x128xf32>
      %c0_71 = arith.constant 0 : index
      %c0_72 = arith.constant 0 : index
      %251 = vector.load %arg5[%c0_71, %c0_72] : memref<8x128xf32, #tpu.memory_space<vmem>>, vector<8x128xf32>
      tpu.vector_store %arg5[%c0_71, %c0_72], %250 {strides = array<i32>} : memref<8x128xf32, #tpu.memory_space<vmem>>, vector<8x128xf32>,
      %cst_73 = arith.constant 0.000000e+00 : f32
      %252 = vector.broadcast %cst_73 : f32 to vector<8x128xf32>
      %c0_74 = arith.constant 0 : index
      %c0_75 = arith.constant 0 : index
      %253 = vector.load %arg6[%c0_74, %c0_75] : memref<8x128xf32, #tpu.memory_space<vmem>>, vector<8x128xf32>
      tpu.vector_store %arg6[%c0_74, %c0_75], %252 {strides = array<i32>} : memref<8x128xf32, #tpu.memory_space<vmem>>, vector<8x128xf32>,
    } else {
    }
    %c0 = arith.constant 0 : index
    %c0_1 = arith.constant 0 : index
    %3 = vector.load %arg2[%c0, %c0_1] : memref<8x512xbf16, #tpu.memory_space<vmem>>, vector<8x512xbf16>
    %c0_2 = arith.constant 0 : index
    %c0_3 = arith.constant 0 : index
    %4 = vector.load %arg3[%c0_2, %c0_3] : memref<128x512xbf16, #tpu.memory_space<vmem>>, vector<128x512xbf16>
    %c0_4 = arith.constant 0 : index
    %c0_5 = arith.constant 0 : index
    %5 = vector.load %arg4[%c0_4, %c0_5] : memref<1x512xf32, #tpu.memory_space<vmem>>, vector<1x512xf32>
    %c0_6 = arith.constant 0 : index
    %c0_7 = arith.constant 0 : index
    %6 = vector.load %arg5[%c0_6, %c0_7] : memref<8x128xf32, #tpu.memory_space<vmem>>, vector<8x128xf32>
    %c0_8 = arith.constant 0 : index
    %c0_9 = arith.constant 0 : index
    %7 = vector.load %arg6[%c0_8, %c0_9] : memref<8x128xf32, #tpu.memory_space<vmem>>, vector<8x128xf32>
    %c0_i32_10 = arith.constant 0 : i32
    %8 = arith.index_cast %c0_i32_10 : i32 to index
    %c0_11 = arith.constant 0 : index
    %c0_12 = arith.constant 0 : index
    %9 = vector.load %arg1[%8, %c0_11, %c0_12] : memref<8x8x8xbf16, #tpu.memory_space<vmem>>, vector<1x8x8xbf16>
    %10 = vector.shape_cast %9 : vector<1x8x8xbf16> to vector<8x8xbf16>
    %cst = arith.constant dense<0.000000e+00> : vector<8x512xf32>
    %11 = tpu.matmul %10, %3, %cst {dimension_numbers = #tpu.dot_dimension_numbers<[1], [0], [0], [1], [0, 0, 1, 1], [], []>} : vector<8x8xbf16>, vector<8x512xbf16>, vector<8x512xf32> -> vector<8x512xf32>
    %12 = arith.truncf %6 : vector<8x128xf32> to vector<8x128xbf16>
    %cst_13 = arith.constant dense<0.000000e+00> : vector<8x512xf32>
    %13 = tpu.matmul %12, %4, %cst_13 {dimension_numbers = #tpu.dot_dimension_numbers<[1], [0], [0], [1], [0, 0, 1, 1], [], []>} : vector<8x128xbf16>, vector<128x512xbf16>, vector<8x512xf32> -> vector<8x512xf32>
    %14 = arith.addf %11, %13 : vector<8x512xf32>
    %15 = vector.broadcast %5 : vector<1x512xf32> to vector<8x512xf32>
    %16 = arith.addf %14, %15 : vector<8x512xf32>
    %17 = vector.extract_strided_slice %16 {offsets = [0, 0], sizes = [8, 384], strides = [1, 1]} : vector<8x512xf32> to vector<8x384xf32>
    %18 = arith.negf %17 : vector<8x384xf32>
    %19 = math.exp %18 : vector<8x384xf32>
    %cst_14 = arith.constant 1.000000e+00 : f32
    %20 = vector.broadcast %cst_14 : f32 to vector<8x384xf32>
    %21 = arith.addf %20, %19 : vector<8x384xf32>
    %22 = arith.divf %20, %21 : vector<8x384xf32>
    %23 = vector.extract_strided_slice %16 {offsets = [0, 384], sizes = [8, 128], strides = [1, 1]} : vector<8x512xf32> to vector<8x128xf32>
    %24 = math.tanh %23 : vector<8x128xf32>
    %25 = vector.extract_strided_slice %22 {offsets = [0, 0], sizes = [8, 128], strides = [1, 1]} : vector<8x384xf32> to vector<8x128xf32>
    %26 = vector.extract_strided_slice %22 {offsets = [0, 128], sizes = [8, 128], strides = [1, 1]} : vector<8x384xf32> to vector<8x128xf32>
    %27 = vector.extract_strided_slice %22 {offsets = [0, 256], sizes = [8, 128], strides = [1, 1]} : vector<8x384xf32> to vector<8x128xf32>
    %28 = arith.mulf %26, %7 : vector<8x128xf32>
    %29 = arith.mulf %25, %24 : vector<8x128xf32>
    %30 = arith.addf %28, %29 : vector<8x128xf32>
    %31 = math.tanh %30 : vector<8x128xf32>
    %32 = arith.mulf %27, %31 : vector<8x128xf32>
    %c8_i32 = arith.constant 8 : i32
    %33 = arith.muli %arg0, %c8_i32 : i32
    %34 = arith.addi %33, %c0_i32_10 : i32
    %c8_i32_15 = arith.constant 8 : i32
    %35 = arith.cmpi slt, %34, %c8_i32_15 : i32
    %36 = arith.select %35, %32, %6 : vector<8x128xf32>
    %37 = arith.select %35, %30, %7 : vector<8x128xf32>
    %c1_i32 = arith.constant 1 : i32
    %38 = arith.index_cast %c1_i32 : i32 to index
    %c0_16 = arith.constant 0 : index
    %c0_17 = arith.constant 0 : index
    %39 = vector.load %arg1[%38, %c0_16, %c0_17] : memref<8x8x8xbf16, #tpu.memory_space<vmem>>, vector<1x8x8xbf16>
    %40 = vector.shape_cast %39 : vector<1x8x8xbf16> to vector<8x8xbf16>
    %cst_18 = arith.constant dense<0.000000e+00> : vector<8x512xf32>
    %41 = tpu.matmul %40, %3, %cst_18 {dimension_numbers = #tpu.dot_dimension_numbers<[1], [0], [0], [1], [0, 0, 1, 1], [], []>} : vector<8x8xbf16>, vector<8x512xbf16>, vector<8x512xf32> -> vector<8x512xf32>
    %42 = arith.truncf %36 : vector<8x128xf32> to vector<8x128xbf16>
    %cst_19 = arith.constant dense<0.000000e+00> : vector<8x512xf32>
    %43 = tpu.matmul %42, %4, %cst_19 {dimension_numbers = #tpu.dot_dimension_numbers<[1], [0], [0], [1], [0, 0, 1, 1], [], []>} : vector<8x128xbf16>, vector<128x512xbf16>, vector<8x512xf32> -> vector<8x512xf32>
    %44 = arith.addf %41, %43 : vector<8x512xf32>
    %45 = vector.broadcast %5 : vector<1x512xf32> to vector<8x512xf32>
    %46 = arith.addf %44, %45 : vector<8x512xf32>
    %47 = vector.extract_strided_slice %46 {offsets = [0, 0], sizes = [8, 384], strides = [1, 1]} : vector<8x512xf32> to vector<8x384xf32>
    %48 = arith.negf %47 : vector<8x384xf32>
    %49 = math.exp %48 : vector<8x384xf32>
    %cst_20 = arith.constant 1.000000e+00 : f32
    %50 = vector.broadcast %cst_20 : f32 to vector<8x384xf32>
    %51 = arith.addf %50, %49 : vector<8x384xf32>
    %52 = arith.divf %50, %51 : vector<8x384xf32>
    %53 = vector.extract_strided_slice %46 {offsets = [0, 384], sizes = [8, 128], strides = [1, 1]} : vector<8x512xf32> to vector<8x128xf32>
    %54 = math.tanh %53 : vector<8x128xf32>
    %55 = vector.extract_strided_slice %52 {offsets = [0, 0], sizes = [8, 128], strides = [1, 1]} : vector<8x384xf32> to vector<8x128xf32>
    %56 = vector.extract_strided_slice %52 {offsets = [0, 128], sizes = [8, 128], strides = [1, 1]} : vector<8x384xf32> to vector<8x128xf32>
    %57 = vector.extract_strided_slice %52 {offsets = [0, 256], sizes = [8, 128], strides = [1, 1]} : vector<8x384xf32> to vector<8x128xf32>
    %58 = arith.mulf %56, %37 : vector<8x128xf32>
    %59 = arith.mulf %55, %54 : vector<8x128xf32>
    %60 = arith.addf %58, %59 : vector<8x128xf32>
    %61 = math.tanh %60 : vector<8x128xf32>
    %62 = arith.mulf %57, %61 : vector<8x128xf32>
    %c8_i32_21 = arith.constant 8 : i32
    %63 = arith.muli %arg0, %c8_i32_21 : i32
    %64 = arith.addi %63, %c1_i32 : i32
    %c8_i32_22 = arith.constant 8 : i32
    %65 = arith.cmpi slt, %64, %c8_i32_22 : i32
    %66 = arith.select %65, %62, %36 : vector<8x128xf32>
    %67 = arith.select %65, %60, %37 : vector<8x128xf32>
    %c2_i32 = arith.constant 2 : i32
    %68 = arith.index_cast %c2_i32 : i32 to index
    %c0_23 = arith.constant 0 : index
    %c0_24 = arith.constant 0 : index
    %69 = vector.load %arg1[%68, %c0_23, %c0_24] : memref<8x8x8xbf16, #tpu.memory_space<vmem>>, vector<1x8x8xbf16>
    %70 = vector.shape_cast %69 : vector<1x8x8xbf16> to vector<8x8xbf16>
    %cst_25 = arith.constant dense<0.000000e+00> : vector<8x512xf32>
    %71 = tpu.matmul %70, %3, %cst_25 {dimension_numbers = #tpu.dot_dimension_numbers<[1], [0], [0], [1], [0, 0, 1, 1], [], []>} : vector<8x8xbf16>, vector<8x512xbf16>, vector<8x512xf32> -> vector<8x512xf32>
    %72 = arith.truncf %66 : vector<8x128xf32> to vector<8x128xbf16>
    %cst_26 = arith.constant dense<0.000000e+00> : vector<8x512xf32>
    %73 = tpu.matmul %72, %4, %cst_26 {dimension_numbers = #tpu.dot_dimension_numbers<[1], [0], [0], [1], [0, 0, 1, 1], [], []>} : vector<8x128xbf16>, vector<128x512xbf16>, vector<8x512xf32> -> vector<8x512xf32>
    %74 = arith.addf %71, %73 : vector<8x512xf32>
    %75 = vector.broadcast %5 : vector<1x512xf32> to vector<8x512xf32>
    %76 = arith.addf %74, %75 : vector<8x512xf32>
    %77 = vector.extract_strided_slice %76 {offsets = [0, 0], sizes = [8, 384], strides = [1, 1]} : vector<8x512xf32> to vector<8x384xf32>
    %78 = arith.negf %77 : vector<8x384xf32>
    %79 = math.exp %78 : vector<8x384xf32>
    %cst_27 = arith.constant 1.000000e+00 : f32
    %80 = vector.broadcast %cst_27 : f32 to vector<8x384xf32>
    %81 = arith.addf %80, %79 : vector<8x384xf32>
    %82 = arith.divf %80, %81 : vector<8x384xf32>
    %83 = vector.extract_strided_slice %76 {offsets = [0, 384], sizes = [8, 128], strides = [1, 1]} : vector<8x512xf32> to vector<8x128xf32>
    %84 = math.tanh %83 : vector<8x128xf32>
    %85 = vector.extract_strided_slice %82 {offsets = [0, 0], sizes = [8, 128], strides = [1, 1]} : vector<8x384xf32> to vector<8x128xf32>
    %86 = vector.extract_strided_slice %82 {offsets = [0, 128], sizes = [8, 128], strides = [1, 1]} : vector<8x384xf32> to vector<8x128xf32>
    %87 = vector.extract_strided_slice %82 {offsets = [0, 256], sizes = [8, 128], strides = [1, 1]} : vector<8x384xf32> to vector<8x128xf32>
    %88 = arith.mulf %86, %67 : vector<8x128xf32>
    %89 = arith.mulf %85, %84 : vector<8x128xf32>
    %90 = arith.addf %88, %89 : vector<8x128xf32>
    %91 = math.tanh %90 : vector<8x128xf32>
    %92 = arith.mulf %87, %91 : vector<8x128xf32>
    %c8_i32_28 = arith.constant 8 : i32
    %93 = arith.muli %arg0, %c8_i32_28 : i32
    %94 = arith.addi %93, %c2_i32 : i32
    %c8_i32_29 = arith.constant 8 : i32
    %95 = arith.cmpi slt, %94, %c8_i32_29 : i32
    %96 = arith.select %95, %92, %66 : vector<8x128xf32>
    %97 = arith.select %95, %90, %67 : vector<8x128xf32>
    %c3_i32 = arith.constant 3 : i32
    %98 = arith.index_cast %c3_i32 : i32 to index
    %c0_30 = arith.constant 0 : index
    %c0_31 = arith.constant 0 : index
    %99 = vector.load %arg1[%98, %c0_30, %c0_31] : memref<8x8x8xbf16, #tpu.memory_space<vmem>>, vector<1x8x8xbf16>
    %100 = vector.shape_cast %99 : vector<1x8x8xbf16> to vector<8x8xbf16>
    %cst_32 = arith.constant dense<0.000000e+00> : vector<8x512xf32>
    %101 = tpu.matmul %100, %3, %cst_32 {dimension_numbers = #tpu.dot_dimension_numbers<[1], [0], [0], [1], [0, 0, 1, 1], [], []>} : vector<8x8xbf16>, vector<8x512xbf16>, vector<8x512xf32> -> vector<8x512xf32>
    %102 = arith.truncf %96 : vector<8x128xf32> to vector<8x128xbf16>
    %cst_33 = arith.constant dense<0.000000e+00> : vector<8x512xf32>
    %103 = tpu.matmul %102, %4, %cst_33 {dimension_numbers = #tpu.dot_dimension_numbers<[1], [0], [0], [1], [0, 0, 1, 1], [], []>} : vector<8x128xbf16>, vector<128x512xbf16>, vector<8x512xf32> -> vector<8x512xf32>
    %104 = arith.addf %101, %103 : vector<8x512xf32>
    %105 = vector.broadcast %5 : vector<1x512xf32> to vector<8x512xf32>
    %106 = arith.addf %104, %105 : vector<8x512xf32>
    %107 = vector.extract_strided_slice %106 {offsets = [0, 0], sizes = [8, 384], strides = [1, 1]} : vector<8x512xf32> to vector<8x384xf32>
    %108 = arith.negf %107 : vector<8x384xf32>
    %109 = math.exp %108 : vector<8x384xf32>
    %cst_34 = arith.constant 1.000000e+00 : f32
    %110 = vector.broadcast %cst_34 : f32 to vector<8x384xf32>
    %111 = arith.addf %110, %109 : vector<8x384xf32>
    %112 = arith.divf %110, %111 : vector<8x384xf32>
    %113 = vector.extract_strided_slice %106 {offsets = [0, 384], sizes = [8, 128], strides = [1, 1]} : vector<8x512xf32> to vector<8x128xf32>
    %114 = math.tanh %113 : vector<8x128xf32>
    %115 = vector.extract_strided_slice %112 {offsets = [0, 0], sizes = [8, 128], strides = [1, 1]} : vector<8x384xf32> to vector<8x128xf32>
    %116 = vector.extract_strided_slice %112 {offsets = [0, 128], sizes = [8, 128], strides = [1, 1]} : vector<8x384xf32> to vector<8x128xf32>
    %117 = vector.extract_strided_slice %112 {offsets = [0, 256], sizes = [8, 128], strides = [1, 1]} : vector<8x384xf32> to vector<8x128xf32>
    %118 = arith.mulf %116, %97 : vector<8x128xf32>
    %119 = arith.mulf %115, %114 : vector<8x128xf32>
    %120 = arith.addf %118, %119 : vector<8x128xf32>
    %121 = math.tanh %120 : vector<8x128xf32>
    %122 = arith.mulf %117, %121 : vector<8x128xf32>
    %c8_i32_35 = arith.constant 8 : i32
    %123 = arith.muli %arg0, %c8_i32_35 : i32
    %124 = arith.addi %123, %c3_i32 : i32
    %c8_i32_36 = arith.constant 8 : i32
    %125 = arith.cmpi slt, %124, %c8_i32_36 : i32
    %126 = arith.select %125, %122, %96 : vector<8x128xf32>
    %127 = arith.select %125, %120, %97 : vector<8x128xf32>
    %c4_i32 = arith.constant 4 : i32
    %128 = arith.index_cast %c4_i32 : i32 to index
    %c0_37 = arith.constant 0 : index
    %c0_38 = arith.constant 0 : index
    %129 = vector.load %arg1[%128, %c0_37, %c0_38] : memref<8x8x8xbf16, #tpu.memory_space<vmem>>, vector<1x8x8xbf16>
    %130 = vector.shape_cast %129 : vector<1x8x8xbf16> to vector<8x8xbf16>
    %cst_39 = arith.constant dense<0.000000e+00> : vector<8x512xf32>
    %131 = tpu.matmul %130, %3, %cst_39 {dimension_numbers = #tpu.dot_dimension_numbers<[1], [0], [0], [1], [0, 0, 1, 1], [], []>} : vector<8x8xbf16>, vector<8x512xbf16>, vector<8x512xf32> -> vector<8x512xf32>
    %132 = arith.truncf %126 : vector<8x128xf32> to vector<8x128xbf16>
    %cst_40 = arith.constant dense<0.000000e+00> : vector<8x512xf32>
    %133 = tpu.matmul %132, %4, %cst_40 {dimension_numbers = #tpu.dot_dimension_numbers<[1], [0], [0], [1], [0, 0, 1, 1], [], []>} : vector<8x128xbf16>, vector<128x512xbf16>, vector<8x512xf32> -> vector<8x512xf32>
    %134 = arith.addf %131, %133 : vector<8x512xf32>
    %135 = vector.broadcast %5 : vector<1x512xf32> to vector<8x512xf32>
    %136 = arith.addf %134, %135 : vector<8x512xf32>
    %137 = vector.extract_strided_slice %136 {offsets = [0, 0], sizes = [8, 384], strides = [1, 1]} : vector<8x512xf32> to vector<8x384xf32>
    %138 = arith.negf %137 : vector<8x384xf32>
    %139 = math.exp %138 : vector<8x384xf32>
    %cst_41 = arith.constant 1.000000e+00 : f32
    %140 = vector.broadcast %cst_41 : f32 to vector<8x384xf32>
    %141 = arith.addf %140, %139 : vector<8x384xf32>
    %142 = arith.divf %140, %141 : vector<8x384xf32>
    %143 = vector.extract_strided_slice %136 {offsets = [0, 384], sizes = [8, 128], strides = [1, 1]} : vector<8x512xf32> to vector<8x128xf32>
    %144 = math.tanh %143 : vector<8x128xf32>
    %145 = vector.extract_strided_slice %142 {offsets = [0, 0], sizes = [8, 128], strides = [1, 1]} : vector<8x384xf32> to vector<8x128xf32>
    %146 = vector.extract_strided_slice %142 {offsets = [0, 128], sizes = [8, 128], strides = [1, 1]} : vector<8x384xf32> to vector<8x128xf32>
    %147 = vector.extract_strided_slice %142 {offsets = [0, 256], sizes = [8, 128], strides = [1, 1]} : vector<8x384xf32> to vector<8x128xf32>
    %148 = arith.mulf %146, %127 : vector<8x128xf32>
    %149 = arith.mulf %145, %144 : vector<8x128xf32>
    %150 = arith.addf %148, %149 : vector<8x128xf32>
    %151 = math.tanh %150 : vector<8x128xf32>
    %152 = arith.mulf %147, %151 : vector<8x128xf32>
    %c8_i32_42 = arith.constant 8 : i32
    %153 = arith.muli %arg0, %c8_i32_42 : i32
    %154 = arith.addi %153, %c4_i32 : i32
    %c8_i32_43 = arith.constant 8 : i32
    %155 = arith.cmpi slt, %154, %c8_i32_43 : i32
    %156 = arith.select %155, %152, %126 : vector<8x128xf32>
    %157 = arith.select %155, %150, %127 : vector<8x128xf32>
    %c5_i32 = arith.constant 5 : i32
    %158 = arith.index_cast %c5_i32 : i32 to index
    %c0_44 = arith.constant 0 : index
    %c0_45 = arith.constant 0 : index
    %159 = vector.load %arg1[%158, %c0_44, %c0_45] : memref<8x8x8xbf16, #tpu.memory_space<vmem>>, vector<1x8x8xbf16>
    %160 = vector.shape_cast %159 : vector<1x8x8xbf16> to vector<8x8xbf16>
    %cst_46 = arith.constant dense<0.000000e+00> : vector<8x512xf32>
    %161 = tpu.matmul %160, %3, %cst_46 {dimension_numbers = #tpu.dot_dimension_numbers<[1], [0], [0], [1], [0, 0, 1, 1], [], []>} : vector<8x8xbf16>, vector<8x512xbf16>, vector<8x512xf32> -> vector<8x512xf32>
    %162 = arith.truncf %156 : vector<8x128xf32> to vector<8x128xbf16>
    %cst_47 = arith.constant dense<0.000000e+00> : vector<8x512xf32>
    %163 = tpu.matmul %162, %4, %cst_47 {dimension_numbers = #tpu.dot_dimension_numbers<[1], [0], [0], [1], [0, 0, 1, 1], [], []>} : vector<8x128xbf16>, vector<128x512xbf16>, vector<8x512xf32> -> vector<8x512xf32>
    %164 = arith.addf %161, %163 : vector<8x512xf32>
    %165 = vector.broadcast %5 : vector<1x512xf32> to vector<8x512xf32>
    %166 = arith.addf %164, %165 : vector<8x512xf32>
    %167 = vector.extract_strided_slice %166 {offsets = [0, 0], sizes = [8, 384], strides = [1, 1]} : vector<8x512xf32> to vector<8x384xf32>
    %168 = arith.negf %167 : vector<8x384xf32>
    %169 = math.exp %168 : vector<8x384xf32>
    %cst_48 = arith.constant 1.000000e+00 : f32
    %170 = vector.broadcast %cst_48 : f32 to vector<8x384xf32>
    %171 = arith.addf %170, %169 : vector<8x384xf32>
    %172 = arith.divf %170, %171 : vector<8x384xf32>
    %173 = vector.extract_strided_slice %166 {offsets = [0, 384], sizes = [8, 128], strides = [1, 1]} : vector<8x512xf32> to vector<8x128xf32>
    %174 = math.tanh %173 : vector<8x128xf32>
    %175 = vector.extract_strided_slice %172 {offsets = [0, 0], sizes = [8, 128], strides = [1, 1]} : vector<8x384xf32> to vector<8x128xf32>
    %176 = vector.extract_strided_slice %172 {offsets = [0, 128], sizes = [8, 128], strides = [1, 1]} : vector<8x384xf32> to vector<8x128xf32>
    %177 = vector.extract_strided_slice %172 {offsets = [0, 256], sizes = [8, 128], strides = [1, 1]} : vector<8x384xf32> to vector<8x128xf32>
    %178 = arith.mulf %176, %157 : vector<8x128xf32>
    %179 = arith.mulf %175, %174 : vector<8x128xf32>
    %180 = arith.addf %178, %179 : vector<8x128xf32>
    %181 = math.tanh %180 : vector<8x128xf32>
    %182 = arith.mulf %177, %181 : vector<8x128xf32>
    %c8_i32_49 = arith.constant 8 : i32
    %183 = arith.muli %arg0, %c8_i32_49 : i32
    %184 = arith.addi %183, %c5_i32 : i32
    %c8_i32_50 = arith.constant 8 : i32
    %185 = arith.cmpi slt, %184, %c8_i32_50 : i32
    %186 = arith.select %185, %182, %156 : vector<8x128xf32>
    %187 = arith.select %185, %180, %157 : vector<8x128xf32>
    %c6_i32 = arith.constant 6 : i32
    %188 = arith.index_cast %c6_i32 : i32 to index
    %c0_51 = arith.constant 0 : index
    %c0_52 = arith.constant 0 : index
    %189 = vector.load %arg1[%188, %c0_51, %c0_52] : memref<8x8x8xbf16, #tpu.memory_space<vmem>>, vector<1x8x8xbf16>
    %190 = vector.shape_cast %189 : vector<1x8x8xbf16> to vector<8x8xbf16>
    %cst_53 = arith.constant dense<0.000000e+00> : vector<8x512xf32>
    %191 = tpu.matmul %190, %3, %cst_53 {dimension_numbers = #tpu.dot_dimension_numbers<[1], [0], [0], [1], [0, 0, 1, 1], [], []>} : vector<8x8xbf16>, vector<8x512xbf16>, vector<8x512xf32> -> vector<8x512xf32>
    %192 = arith.truncf %186 : vector<8x128xf32> to vector<8x128xbf16>
    %cst_54 = arith.constant dense<0.000000e+00> : vector<8x512xf32>
    %193 = tpu.matmul %192, %4, %cst_54 {dimension_numbers = #tpu.dot_dimension_numbers<[1], [0], [0], [1], [0, 0, 1, 1], [], []>} : vector<8x128xbf16>, vector<128x512xbf16>, vector<8x512xf32> -> vector<8x512xf32>
    %194 = arith.addf %191, %193 : vector<8x512xf32>
    %195 = vector.broadcast %5 : vector<1x512xf32> to vector<8x512xf32>
    %196 = arith.addf %194, %195 : vector<8x512xf32>
    %197 = vector.extract_strided_slice %196 {offsets = [0, 0], sizes = [8, 384], strides = [1, 1]} : vector<8x512xf32> to vector<8x384xf32>
    %198 = arith.negf %197 : vector<8x384xf32>
    %199 = math.exp %198 : vector<8x384xf32>
    %cst_55 = arith.constant 1.000000e+00 : f32
    %200 = vector.broadcast %cst_55 : f32 to vector<8x384xf32>
    %201 = arith.addf %200, %199 : vector<8x384xf32>
    %202 = arith.divf %200, %201 : vector<8x384xf32>
    %203 = vector.extract_strided_slice %196 {offsets = [0, 384], sizes = [8, 128], strides = [1, 1]} : vector<8x512xf32> to vector<8x128xf32>
    %204 = math.tanh %203 : vector<8x128xf32>
    %205 = vector.extract_strided_slice %202 {offsets = [0, 0], sizes = [8, 128], strides = [1, 1]} : vector<8x384xf32> to vector<8x128xf32>
    %206 = vector.extract_strided_slice %202 {offsets = [0, 128], sizes = [8, 128], strides = [1, 1]} : vector<8x384xf32> to vector<8x128xf32>
    %207 = vector.extract_strided_slice %202 {offsets = [0, 256], sizes = [8, 128], strides = [1, 1]} : vector<8x384xf32> to vector<8x128xf32>
    %208 = arith.mulf %206, %187 : vector<8x128xf32>
    %209 = arith.mulf %205, %204 : vector<8x128xf32>
    %210 = arith.addf %208, %209 : vector<8x128xf32>
    %211 = math.tanh %210 : vector<8x128xf32>
    %212 = arith.mulf %207, %211 : vector<8x128xf32>
    %c8_i32_56 = arith.constant 8 : i32
    %213 = arith.muli %arg0, %c8_i32_56 : i32
    %214 = arith.addi %213, %c6_i32 : i32
    %c8_i32_57 = arith.constant 8 : i32
    %215 = arith.cmpi slt, %214, %c8_i32_57 : i32
    %216 = arith.select %215, %212, %186 : vector<8x128xf32>
    %217 = arith.select %215, %210, %187 : vector<8x128xf32>
    %c7_i32 = arith.constant 7 : i32
    %218 = arith.index_cast %c7_i32 : i32 to index
    %c0_58 = arith.constant 0 : index
    %c0_59 = arith.constant 0 : index
    %219 = vector.load %arg1[%218, %c0_58, %c0_59] : memref<8x8x8xbf16, #tpu.memory_space<vmem>>, vector<1x8x8xbf16>
    %220 = vector.shape_cast %219 : vector<1x8x8xbf16> to vector<8x8xbf16>
    %cst_60 = arith.constant dense<0.000000e+00> : vector<8x512xf32>
    %221 = tpu.matmul %220, %3, %cst_60 {dimension_numbers = #tpu.dot_dimension_numbers<[1], [0], [0], [1], [0, 0, 1, 1], [], []>} : vector<8x8xbf16>, vector<8x512xbf16>, vector<8x512xf32> -> vector<8x512xf32>
    %222 = arith.truncf %216 : vector<8x128xf32> to vector<8x128xbf16>
    %cst_61 = arith.constant dense<0.000000e+00> : vector<8x512xf32>
    %223 = tpu.matmul %222, %4, %cst_61 {dimension_numbers = #tpu.dot_dimension_numbers<[1], [0], [0], [1], [0, 0, 1, 1], [], []>} : vector<8x128xbf16>, vector<128x512xbf16>, vector<8x512xf32> -> vector<8x512xf32>
    %224 = arith.addf %221, %223 : vector<8x512xf32>
    %225 = vector.broadcast %5 : vector<1x512xf32> to vector<8x512xf32>
    %226 = arith.addf %224, %225 : vector<8x512xf32>
    %227 = vector.extract_strided_slice %226 {offsets = [0, 0], sizes = [8, 384], strides = [1, 1]} : vector<8x512xf32> to vector<8x384xf32>
    %228 = arith.negf %227 : vector<8x384xf32>
    %229 = math.exp %228 : vector<8x384xf32>
    %cst_62 = arith.constant 1.000000e+00 : f32
    %230 = vector.broadcast %cst_62 : f32 to vector<8x384xf32>
    %231 = arith.addf %230, %229 : vector<8x384xf32>
    %232 = arith.divf %230, %231 : vector<8x384xf32>
    %233 = vector.extract_strided_slice %226 {offsets = [0, 384], sizes = [8, 128], strides = [1, 1]} : vector<8x512xf32> to vector<8x128xf32>
    %234 = math.tanh %233 : vector<8x128xf32>
    %235 = vector.extract_strided_slice %232 {offsets = [0, 0], sizes = [8, 128], strides = [1, 1]} : vector<8x384xf32> to vector<8x128xf32>
    %236 = vector.extract_strided_slice %232 {offsets = [0, 128], sizes = [8, 128], strides = [1, 1]} : vector<8x384xf32> to vector<8x128xf32>
    %237 = vector.extract_strided_slice %232 {offsets = [0, 256], sizes = [8, 128], strides = [1, 1]} : vector<8x384xf32> to vector<8x128xf32>
    %238 = arith.mulf %236, %217 : vector<8x128xf32>
    %239 = arith.mulf %235, %234 : vector<8x128xf32>
    %240 = arith.addf %238, %239 : vector<8x128xf32>
    %241 = math.tanh %240 : vector<8x128xf32>
    %242 = arith.mulf %237, %241 : vector<8x128xf32>
    %c8_i32_63 = arith.constant 8 : i32
    %243 = arith.muli %arg0, %c8_i32_63 : i32
    %244 = arith.addi %243, %c7_i32 : i32
    %c8_i32_64 = arith.constant 8 : i32
    %245 = arith.cmpi slt, %244, %c8_i32_64 : i32
    %246 = arith.select %245, %242, %216 : vector<8x128xf32>
    %247 = arith.select %245, %240, %217 : vector<8x128xf32>
    %c8_i32_65 = arith.constant 8 : i32
    %c0_66 = arith.constant 0 : index
    %c0_67 = arith.constant 0 : index
    %248 = vector.load %arg5[%c0_66, %c0_67] : memref<8x128xf32, #tpu.memory_space<vmem>>, vector<8x128xf32>
    tpu.vector_store %arg5[%c0_66, %c0_67], %246 {strides = array<i32>} : memref<8x128xf32, #tpu.memory_space<vmem>>, vector<8x128xf32>,
    %c0_68 = arith.constant 0 : index
    %c0_69 = arith.constant 0 : index
    %249 = vector.load %arg6[%c0_68, %c0_69] : memref<8x128xf32, #tpu.memory_space<vmem>>, vector<8x128xf32>
    tpu.vector_store %arg6[%c0_68, %c0_69], %247 {strides = array<i32>} : memref<8x128xf32, #tpu.memory_space<vmem>>, vector<8x128xf32>,
    return
  }
  func.func @transform_0(%arg0: i32) -> (i32, i32, i32) {
    %c0_i32 = arith.constant 0 : i32
    %c0_i32_0 = arith.constant 0 : i32
    %c0_i32_1 = arith.constant 0 : i32
    return %arg0, %c0_i32, %c0_i32_0 : i32, i32, i32
  }
  func.func @transform_1(%arg0: i32) -> (i32, i32) {
    %c0_i32 = arith.constant 0 : i32
    %c0_i32_0 = arith.constant 0 : i32
    %c0_i32_1 = arith.constant 0 : i32
    return %c0_i32, %c0_i32_0 : i32, i32
  }
  func.func @transform_2(%arg0: i32) -> (i32, i32) {
    %c0_i32 = arith.constant 0 : i32
    %c0_i32_0 = arith.constant 0 : i32
    %c0_i32_1 = arith.constant 0 : i32
    return %c0_i32, %c0_i32_0 : i32, i32
  }
  func.func @transform_3(%arg0: i32) -> (i32, i32) {
    %c0_i32 = arith.constant 0 : i32
    %c0_i32_0 = arith.constant 0 : i32
    %c0_i32_1 = arith.constant 0 : i32
    return %c0_i32, %c0_i32_0 : i32, i32
  }
  func.func @transform_4(%arg0: i32) -> (i32, i32) {
    %c0_i32 = arith.constant 0 : i32
    %c0_i32_0 = arith.constant 0 : i32
    %c0_i32_1 = arith.constant 0 : i32
    return %c0_i32, %c0_i32_0 : i32, i32
  }
  func.func @transform_5(%arg0: i32) -> (i32, i32) {
    %c0_i32 = arith.constant 0 : i32
    %c0_i32_0 = arith.constant 0 : i32
    %c0_i32_1 = arith.constant 0 : i32
    return %c0_i32, %c0_i32_0 : i32, i32
  }
}

</mosaic_0001>

<bundles_post_ra>
// kernel: tpu_custom_call.1
= control target key start
LH: loop header
LB: loop body
LE: loop exit
PB: predicated region body
PF: predicated region fallthrough
CT: control target
= control target key end

     0   :  { %11 = vsyncpa [#allocation3], 0  ;;  %s2857_s0 = inlined_call_operand.hbm [shape: bf16[8,8,8], index: 0, kind: input, shape index: {}]   ;;  %s2858_s1 = inlined_call_operand.hbm [shape: bf16[8,512], index: 1, kind: input, shape index: {}]   ;;  %s2859_s2 = inlined_call_operand.hbm [shape: bf16[128,512], index: 2, kind: input, shape index: {}]   ;;  %s2860_s3 = inlined_call_operand.hbm [shape: f32[1,512], index: 3, kind: input, shape index: {}]   ;;  %s2861_s4 = inlined_call_operand.hbm [shape: f32[8,128], index: 4, kind: output, shape index: {0}]   ;;  %s2862_s5 = inlined_call_operand.hbm [shape: f32[8,128], index: 5, kind: output, shape index: {1}]  }
   0x1   :  { %12 = vsyncpa [#allocation6], 0 }
   0x2   :  { %13 = vsyncpa [#allocation9], 0 }
   0x3   :  { %14 = vsyncpa [#allocation4], 0  ;;  %s34_s20 = sshll.u32 %s2858_s1, 4  ;;  %s35_s20 = int_to_ptr.hbm [resolvable:$true] %s34_s20 }
   0x4   :  { %15 = vsyncpa [#allocation12], 0  ;;  %s2334_s21 = smov [#allocation5]   ;;  %s20_s25 = sshll.u32 %s2857_s0, 4  ;;  %s21_s25 = int_to_ptr.hbm [resolvable:$true] %s20_s25 }
   0x5   :  { %s36_s22 = sshll.u32 %s2334_s21, 4  ;;  %s2335_s26 = smov [#allocation2]   ;;  %s37_s22 = int_to_ptr.vmem [resolvable:$true] %s36_s22 }
   0x6   :  { %39 = dma.hbm_to_vmem [thread:$0]  %s35_s20, 256, %s37_s22, [#allocation6]  }
   0x7   :  { %s22_s27 = sshll.u32 %s2335_s26, 4  ;;  %s2336_s28 = smov 64   ;;  %s23_s27 = int_to_ptr.vmem [resolvable:$true] %s22_s27 }
   0x8   :  { %s2337_s29 = smov 4   ;;  %s44_s1 = sshll.u32 %s2859_s2, 4  ;;  %s45_s1 = int_to_ptr.hbm [resolvable:$true] %s44_s1 }
   0x9   :  { %28 = dma.hbm_to_vmem [thread:$0]  %s21_s25, 512, %s23_s27, [#allocation3], %s2336_s28, %s2336_s28, %s2337_s29  }
   0xa   :  { %s2338_s7 = smov [#allocation7]   ;;  %s58_s0 = sshll.u32 %s2860_s3, 4  ;;  %s59_s0 = int_to_ptr.hbm [resolvable:$true] %s58_s0 }
   0xb   :  { %s46_s8 = sshll.u32 %s2338_s7, 4  ;;  %s2339_s11 = smov 256   ;;  %s47_s8 = int_to_ptr.vmem [resolvable:$true] %s46_s8 }
   0xc   :  { %s2340_s12 = smov 16   ;;  %s2341_s13 = smov [#allocation8]  }
   0xd   :  { %52 = dma.hbm_to_vmem [thread:$0]  %s45_s1, 4096, %s47_s8, [#allocation6], %s2339_s11, %s2339_s11, %s2340_s12  }
   0xe   :  { %s60_s14 = sshll.u32 %s2341_s13, 4  ;;  %s61_s14 = int_to_ptr.vmem [resolvable:$true] %s60_s14 }
   0xf   :  { %63 = dma.hbm_to_vmem [thread:$0]  %s59_s0, 64, %s61_s14, [#allocation9]  }
  0x10   :  { %2324 = dma.done.wait [#allocation3], 512  }
  0x11   :  { %2325 = vsyncadd [#allocation3], 4294966784 }
  0x12   :  { %2326 = dma.done.wait [#allocation6], 4352  }
  0x13   :  { %2327 = vsyncadd [#allocation6], 4294962944 }
  0x14   :  { %2328 = dma.done.wait [#allocation9], 64  }
  0x15   :  { %2329 = vsyncadd [#allocation9], 4294967232  ;;  %v1939_v0 = vld [vmem:[#allocation7 + $0xe0] sm:$0xf]  ;;  %v2039_v1 = vld [vmem:[#allocation7 + $0xec] sm:$0xf0] }
  0x16   :  { %v2037_v2 = vld [vmem:[#allocation7 + $0xe4] sm:$0xf]  ;;  %v2387_v3 = vor.u32 %v2039_v1, %v1939_v0  ;;  %v1941_v4 = vld [vmem:[#allocation7 + $0xf0] sm:$0xf0]  ;;  %v1947_v5 = vld [vmem:[#allocation7 + $0xe8] sm:$0xf] }
  0x17   :  { %v2040_v6 = vld [vmem:[#allocation7 + $0xf4] sm:$0xf0]  ;;  %v2389_v7 = vor.u32 %v2037_v2, %v1941_v4  ;;  %v2038_v9 = vld [vmem:[#allocation7 + $0xec] sm:$0xf]  ;;  %v1949_v10 = vld [vmem:[#allocation7 + $0xf8] sm:$0xf0] }
  0x18   :  { %v2391_v8 = vor.u32 %v2040_v6, %v1947_v5  ;;  %v1923_v11 = vld [vmem:[#allocation7 + $0xc0] sm:$0xf]  ;;  %286 = vmatpush.bf16.msra.mxu0 %v2387_v3  ;;  %v2394_v12 = vor.u32 %v2038_v9, %v1949_v10  ;;  %v2035_v13 = vld [vmem:[#allocation7 + $0xcc] sm:$0xf0]  ;;  %v2033_v14 = vld [vmem:[#allocation7 + $0xc4] sm:$0xf] }
  0x19   :  { %v1925_v15 = vld [vmem:[#allocation7 + $0xd0] sm:$0xf0]  ;;  %299 = vmatpush.bf16.msra.mxu1 %v2389_v7  ;;  %v2398_v16 = vor.u32 %v2035_v13, %v1923_v11  ;;  %v1931_v18 = vld [vmem:[#allocation7 + $0xc8] sm:$0xf]  ;;  %v2036_v19 = vld [vmem:[#allocation7 + $0xd4] sm:$0xf0] }
  0x1a   :  { %312 = vmatpush.bf16.msra.mxu2 %v2391_v8  ;;  %v2400_v17 = vor.u32 %v2033_v14, %v1925_v15  ;;  %v2034_v20 = vld [vmem:[#allocation7 + $0xcc] sm:$0xf]  ;;  %325 = vmatpush.bf16.msra.mxu3 %v2394_v12  ;;  %v2403_v21 = vor.u32 %v2036_v19, %v1931_v18  ;;  %v1933_v22 = vld [vmem:[#allocation7 + $0xd8] sm:$0xf0]  ;;  %v1907_v23 = vld [vmem:[#allocation7 + $0xa0] sm:$0xf] }
  0x1b   :  { %v2031_v24 = vld [vmem:[#allocation7 + $0xac] sm:$0xf0]  ;;  %v2405_v25 = vor.u32 %v2034_v20, %v1933_v22  ;;  %v2029_v26 = vld [vmem:[#allocation7 + $0xa4] sm:$0xf]  ;;  %v1909_v27 = vld [vmem:[#allocation7 + $0xb0] sm:$0xf0] }
  0x1c   :  { %v1915_v28 = vld [vmem:[#allocation7 + $0xa8] sm:$0xf]  ;;  %287 = vmatpush.bf16.msra.mxu0 %v2398_v16  ;;  %v2408_v29 = vor.u32 %v2031_v24, %v1907_v23  ;;  %v2032_v30 = vld [vmem:[#allocation7 + $0xb4] sm:$0xf0]  ;;  %v2030_v31 = vld [vmem:[#allocation7 + $0xac] sm:$0xf]  ;;  %v2412_v33 = vor.u32 %v2029_v26, %v1909_v27 }
  0x1d   :  { %v1917_v32 = vld [vmem:[#allocation7 + $0xb8] sm:$0xf0]  ;;  %300 = vmatpush.bf16.msra.mxu1 %v2400_v17  ;;  %v2414_v34 = vor.u32 %v2032_v30, %v1915_v28  ;;  %v1891_v35 = vld [vmem:[#allocation7 + $0x80] sm:$0xf]  ;;  %v2027_v36 = vld [vmem:[#allocation7 + $0x8c] sm:$0xf0] }
  0x1e   :  { %313 = vmatpush.bf16.msra.mxu2 %v2403_v21  ;;  %v2025_v37 = vld [vmem:[#allocation7 + $0x84] sm:$0xf]  ;;  %326 = vmatpush.bf16.msra.mxu3 %v2405_v25  ;;  %v2417_v38 = vor.u32 %v2030_v31, %v1917_v32  ;;  %v1893_v39 = vld [vmem:[#allocation7 + $0x90] sm:$0xf0]  ;;  %v1899_v40 = vld [vmem:[#allocation7 + $0x88] sm:$0xf]  ;;  %v2420_v44 = vor.u32 %v2027_v36, %v1891_v35 }
  0x1f   :  { %v2028_v41 = vld [vmem:[#allocation7 + $0x94] sm:$0xf0]  ;;  %v2026_v42 = vld [vmem:[#allocation7 + $0x8c] sm:$0xf]  ;;  %v1901_v43 = vld [vmem:[#allocation7 + $0x98] sm:$0xf0]  ;;  %v2424_v45 = vor.u32 %v2025_v37, %v1893_v39 }
  0x20   :  { %288 = vmatpush.bf16.msra.mxu0 %v2408_v29  ;;  %v2426_v46 = vor.u32 %v2028_v41, %v1899_v40  ;;  %v1875_v47 = vld [vmem:[#allocation7 + $0x60] sm:$0xf]  ;;  %v2023_v48 = vld [vmem:[#allocation7 + $0x6c] sm:$0xf0]  ;;  %v2021_v49 = vld [vmem:[#allocation7 + $0x64] sm:$0xf]  ;;  %v2429_v50 = vor.u32 %v2026_v42, %v1901_v43 }
  0x21   :  { %301 = vmatpush.bf16.msra.mxu1 %v2412_v33  ;;  %v1877_v51 = vld [vmem:[#allocation7 + $0x70] sm:$0xf0]  ;;  %v1883_v52 = vld [vmem:[#allocation7 + $0x68] sm:$0xf]  ;;  %v2024_v53 = vld [vmem:[#allocation7 + $0x74] sm:$0xf0]  ;;  %v2432_v56 = vor.u32 %v2023_v48, %v1875_v47 }
  0x22   :  { %314 = vmatpush.bf16.msra.mxu2 %v2414_v34  ;;  %327 = vmatpush.bf16.msra.mxu3 %v2417_v38  ;;  %v2022_v54 = vld [vmem:[#allocation7 + $0x6c] sm:$0xf]  ;;  %v1885_v55 = vld [vmem:[#allocation7 + $0x78] sm:$0xf0]  ;;  %v2436_v57 = vor.u32 %v2021_v49, %v1877_v51  ;;  %v2438_v58 = vor.u32 %v2024_v53, %v1883_v52  ;;  %v1859_v59 = vld [vmem:[#allocation7 + $0x40] sm:$0xf] }
  0x23   :  { %v2019_v60 = vld [vmem:[#allocation7 + $0x4c] sm:$0xf0]  ;;  %v2017_v61 = vld [vmem:[#allocation7 + $0x44] sm:$0xf]  ;;  %v2441_v62 = vor.u32 %v2022_v54, %v1885_v55  ;;  %v1861_v63 = vld [vmem:[#allocation7 + $0x50] sm:$0xf0] }
  0x24   :  { %289 = vmatpush.bf16.msra.mxu0 %v2420_v44  ;;  %v1867_v0 = vld [vmem:[#allocation7 + $0x48] sm:$0xf]  ;;  %v2020_v1 = vld [vmem:[#allocation7 + $0x54] sm:$0xf0]  ;;  %v2018_v2 = vld [vmem:[#allocation7 + $0x4c] sm:$0xf]  ;;  %v2444_v5 = vor.u32 %v2019_v60, %v1859_v59  ;;  %v2448_v9 = vor.u32 %v2017_v61, %v1861_v63 }
  0x25   :  { %302 = vmatpush.bf16.msra.mxu1 %v2424_v45  ;;  %v1869_v4 = vld [vmem:[#allocation7 + $0x58] sm:$0xf0]  ;;  %v1843_v6 = vld [vmem:[#allocation7 + $0x20] sm:$0xf]  ;;  %v2450_v10 = vor.u32 %v2020_v1, %v1867_v0  ;;  %v2015_v11 = vld [vmem:[#allocation7 + $0x2c] sm:$0xf0] }
  0x26   :  { %315 = vmatpush.bf16.msra.mxu2 %v2426_v46  ;;  %328 = vmatpush.bf16.msra.mxu3 %v2429_v50  ;;  %v2013_v13 = vld [vmem:[#allocation7 + $0x24] sm:$0xf]  ;;  %v1845_v14 = vld [vmem:[#allocation7 + $0x30] sm:$0xf0]  ;;  %v2453_v15 = vor.u32 %v2018_v2, %v1869_v4  ;;  %v1851_v18 = vld [vmem:[#allocation7 + $0x28] sm:$0xf]  ;;  %v2456_v27 = vor.u32 %v2015_v11, %v1843_v6 }
  0x27   :  { %v2016_v19 = vld [vmem:[#allocation7 + $0x34] sm:$0xf0]  ;;  %v87_v20 = vld [vmem:[#allocation5] sm:$0xff]  ;;  %v2014_v22 = vld [vmem:[#allocation7 + $0x2c] sm:$0xf]  ;;  %v2460_v30 = vor.u32 %v2013_v13, %v1845_v14  ;;  %vm352_vm0 = vcmask 1043456  }
  0x28   :  { %290 = vmatpush.bf16.msra.mxu0 %v2432_v56  ;;  %v1853_v23 = vld [vmem:[#allocation7 + $0x38] sm:$0xf0]  ;;  %v340_v24 = vunpack.c.l.b16 %v87_v20  ;;  %v341_v28 = vunpack.c.h.b16 %v87_v20  ;;  %v2462_v31 = vor.u32 %v2016_v19, %v1851_v18  ;;  %v1827_v32 = vld [vmem:[#allocation7] sm:$0xf]  ;;  %v2011_v35 = vld [vmem:[#allocation7 + $0xc] sm:$0xf0] }
  0x29   :  { %303 = vmatpush.bf16.msra.mxu1 %v2436_v57  ;;  %v88_v26 = vld [vmem:[#allocation5 + $0x8] sm:$0xff]  ;;  %v2009_v36 = vld [vmem:[#allocation7 + $0x4] sm:$0xf]  ;;  %v2465_v37 = vor.u32 %v2014_v22, %v1853_v23  ;;  %v1829_v39 = vld [vmem:[#allocation7 + $0x10] sm:$0xf0]  ;;  %v2468_v51 = vor.u32 %v2011_v35, %v1827_v32  ;;  %v2342_v1 = vmov 0.0|0.0  }
  0x2a   :  { %316 = vmatpush.bf16.msra.mxu2 %v2438_v58  ;;  %329 = vmatpush.bf16.msra.mxu3 %v2441_v62  ;;  %v1835_v40 = vld [vmem:[#allocation7 + $0x8] sm:$0xf]  ;;  %v2012_v41 = vld [vmem:[#allocation7 + $0x14] sm:$0xf0]  ;;  %v342_v42 = vunpack.c.l.b16 %v88_v26  ;;  %v2010_v43 = vld [vmem:[#allocation7 + $0xc] sm:$0xf]  ;;  %v344_v48 = vpack.c.b16 %v340_v24, %v340_v24  ;;  %v343_v49 = vunpack.c.h.b16 %v88_v26  ;;  %v345_v52 = vpack.c.b16 %v341_v28, %v341_v28 }
  0x2b   :  { %v1837_v47 = vld [vmem:[#allocation7 + $0x18] sm:$0xf0]  ;;  %v2472_v53 = vor.u32 %v2009_v36, %v1829_v39  ;;  %v2474_v54 = vor.u32 %v2012_v41, %v1835_v40  ;;  %v124_v4 = vld [vmem:[#allocation2] sm:$0xf]  ;;  %vm348_vm1 = vcmask 64512   ;;  %s2343_s2 = smov [#allocation11]  }
  0x2c   :  { %291 = vmatpush.bf16.msra.mxu0 %v2444_v5  ;;  %v2477_v55 = vor.u32 %v2010_v43, %v1837_v47  ;;  %v346_v59 = vpack.c.b16 %v342_v42, %v342_v42  ;;  %v2480_v60 = vsel %vm352_vm0, %v344_v48, 0  ;;  %v347_v61 = vpack.c.b16 %v343_v49, %v343_v49  ;;  %v121_v20 = vld [vmem:[#allocation8] sm:$0xf]  ;;  %s1806_s3 = sshll.u32 %s2343_s2, 4  ;;  %s1808_s17 = sshll.u32 %s2862_s5, 4  ;;  %s1807_s3 = int_to_ptr.vmem [resolvable:$true] %s1806_s3  ;;  %s1809_s17 = int_to_ptr.hbm [resolvable:$true] %s1808_s17 }
  0x2d   :  { %304 = vmatpush.bf16.msra.mxu1 %v2448_v9  ;;  %v2484_v63 = vsel %vm352_vm0, %v345_v52, 0  ;;  %v2539_v23 = vperm.slane %v121_v20, 0  ;;  %v2541_v28 = vperm.slane %v121_v20, 1  ;;  %v2545_v43 = vperm.slane %v121_v20, 2  ;;  %s2344_s18 = smov [#allocation10]   ;;  %s1797_s21 = sshll.u32 %s2861_s4, 4  ;;  %s1798_s21 = int_to_ptr.hbm [resolvable:$true] %s1797_s21 }
  0x2e   :  { %317 = vmatpush.bf16.msra.mxu2 %v2450_v10  ;;  %330 = vmatpush.bf16.msra.mxu3 %v2453_v15  ;;  %v2491_v0 = vsel %vm352_vm0, %v346_v59, 0  ;;  %v2495_v2 = vsel %vm352_vm0, %v347_v61, 0  ;;  %s1795_s19 = sshll.u32 %s2344_s18, 4  ;;  %s1796_s19 = int_to_ptr.vmem [resolvable:$true] %s1795_s19 }
  0x2f   :  { %2867 = vst [vmem:[#allocation18_spill] sm:$0xff] %v2545_v43 }
  0x30   :  { %292 = vmatpush.bf16.msra.mxu0 %v2456_v27 }
  0x31   :  { %305 = vmatpush.bf16.msra.mxu1 %v2460_v30 }
  0x32   :  { %318 = vmatpush.bf16.msra.mxu2 %v2462_v31  ;;  %331 = vmatpush.bf16.msra.mxu3 %v2465_v37 }
  0x34   :  { %293 = vmatpush.bf16.msra.mxu0 %v2468_v51 }
  0x35   :  { %306 = vmatpush.bf16.msra.mxu1 %v2472_v53 }
  0x36   :  { %319 = vmatpush.bf16.msra.mxu2 %v2474_v54  ;;  %332 = vmatpush.bf16.msra.mxu3 %v2477_v55 }
  0x37   :  { %294 = vmatmul.bf16.vlgmr.msra.gmra.mxu0 %v2342_v1 }
  0x38   :  { %372 = vmatpush.bf16.msrb.mxu0 %v2480_v60  ;;  %307 = vmatmul.bf16.vlgmr.msra.gmra.mxu1 %v2342_v1 }
  0x39   :  { %385 = vmatpush.bf16.msrb.mxu1 %v2484_v63  ;;  %320 = vmatmul.bf16.vlgmr.msra.gmra.mxu2 %v2342_v1 }
  0x3a   :  { %333 = vmatmul.bf16.vlgmr.msra.gmra.mxu3 %v2342_v1  ;;  %398 = vmatpush.bf16.msrb.mxu2 %v2491_v0 }
  0x3b   :  { %411 = vmatpush.bf16.msrb.mxu3 %v2495_v2 }
  0x3c   :  { %503 = vmatpush.bf16.msra.mxu0 %v2387_v3 }
  0x3d   :  { %516 = vmatpush.bf16.msra.mxu1 %v2389_v7 }
  0x3e   :  { %529 = vmatpush.bf16.msra.mxu2 %v2391_v8 }
  0x3f   :  { %542 = vmatpush.bf16.msra.mxu3 %v2394_v12 }
  0x40   :  { %504 = vmatpush.bf16.msra.mxu0 %v2398_v16 }
  0x41   :  { %517 = vmatpush.bf16.msra.mxu1 %v2400_v17 }
  0x42   :  { %530 = vmatpush.bf16.msra.mxu2 %v2403_v21 }
  0x43   :  { %543 = vmatpush.bf16.msra.mxu3 %v2405_v25 }
  0x44   :  { %505 = vmatpush.bf16.msra.mxu0 %v2408_v29 }
  0x45   :  { %518 = vmatpush.bf16.msra.mxu1 %v2412_v33 }
  0x46   :  { %531 = vmatpush.bf16.msra.mxu2 %v2414_v34 }
  0x47   :  { %544 = vmatpush.bf16.msra.mxu3 %v2417_v38  ;;  %1953 = vmatmul.msk.bf16.vlgmr.msrb.gmra.mxu0 %vm348_vm1, %v124_v4 }
  0x48   :  { %506 = vmatpush.bf16.msra.mxu0 %v2420_v44  ;;  %1954 = vmatmul.msk.bf16.vlgmr.msrb.gmra.mxu1 %vm348_vm1, %v124_v4 }
  0x49   :  { %519 = vmatpush.bf16.msra.mxu1 %v2424_v45  ;;  %1955 = vmatmul.msk.bf16.vlgmr.msrb.gmra.mxu2 %vm348_vm1, %v124_v4 }
  0x4a   :  { %1956 = vmatmul.msk.bf16.vlgmr.msrb.gmra.mxu3 %vm348_vm1, %v124_v4  ;;  %532 = vmatpush.bf16.msra.mxu2 %v2426_v46 }
  0x4b   :  { %545 = vmatpush.bf16.msra.mxu3 %v2429_v50 }
  0x4c   :  { %507 = vmatpush.bf16.msra.mxu0 %v2432_v56 }
  0x4d   :  { %520 = vmatpush.bf16.msra.mxu1 %v2436_v57 }
  0x4e   :  { %533 = vmatpush.bf16.msra.mxu2 %v2438_v58 }
  0x4f   :  { %546 = vmatpush.bf16.msra.mxu3 %v2441_v62 }
  0x50   :  { %508 = vmatpush.bf16.msra.mxu0 %v2444_v5 }
  0x51   :  { %521 = vmatpush.bf16.msra.mxu1 %v2448_v9 }
  0x52   :  { %534 = vmatpush.bf16.msra.mxu2 %v2450_v10 }
  0x53   :  { %547 = vmatpush.bf16.msra.mxu3 %v2453_v15 }
  0x54   :  { %509 = vmatpush.bf16.msra.mxu0 %v2456_v27 }
  0x55   :  { %522 = vmatpush.bf16.msra.mxu1 %v2460_v30 }
  0x56   :  { %535 = vmatpush.bf16.msra.mxu2 %v2462_v31 }
  0x57   :  { %548 = vmatpush.bf16.msra.mxu3 %v2465_v37 }
  0x58   :  { %510 = vmatpush.bf16.msra.mxu0 %v2468_v51 }
  0x59   :  { %523 = vmatpush.bf16.msra.mxu1 %v2472_v53 }
  0x5a   :  { %536 = vmatpush.bf16.msra.mxu2 %v2474_v54 }
  0x5b   :  { %549 = vmatpush.bf16.msra.mxu3 %v2477_v55 }
  0x5c   :  { %565 = vmatpush.bf16.msrb.mxu0 %v2480_v60 }
  0x5d   :  { %578 = vmatpush.bf16.msrb.mxu1 %v2484_v63 }
  0x5e   :  { %591 = vmatpush.bf16.msrb.mxu2 %v2491_v0 }
  0x5f   :  { %604 = vmatpush.bf16.msrb.mxu3 %v2495_v2 }
  0xb4   :  { %v295_v6 = vpop.f32.mrf.mxu0 }
  0xb5   :  { %v308_v11 = vpop.f32.mrf.mxu1 }
  0xbc   :  { %v321_v13 = vpop.f32.mrf.mxu2  ;;  %v297_v18 = vpop.f32.mrf.mxu0 }
  0xbd   :  { %v334_v14 = vpop.f32.mrf.mxu3  ;;  %v310_v19 = vpop.f32.mrf.mxu1 }
  0xc4   :  { %v323_v22 = vpop.f32.mrf.mxu2  ;;  %v374_v26 = vpop.f32.mrf.mxu0 }
  0xc5   :  { %v336_v24 = vpop.f32.mrf.mxu3  ;;  %v375_v32 = vadd.f32 %v374_v26, %v295_v6  ;;  %v387_v35 = vpop.f32.mrf.mxu1  ;;  %v2548_v26 = vperm.slane %v121_v20, 3 }
  0xc6   :  { %v388_v36 = vadd.f32 %v387_v35, %v308_v11 }
  0xc7   :  { %v426_v39 = vadd.f32 %v2539_v23, %v375_v32  ;;  %2868 = vst [vmem:[#allocation19_spill] sm:$0xff] %v2548_v26 }
  0xc8   :  { %v427_v40 = vadd.f32 %v2541_v28, %v388_v36 }
  0xc9   :  { %v1957_v41 = vmul.f32 -1.442695, %v426_v39 }
  0xca   :  { %v1958_v42 = vmul.f32 -1.442695, %v427_v40 }
  0xcb   :  { %2052 = vpow2.f32 %v1957_v41 }
  0xcc   :  { %v400_v47 = vpop.f32.mrf.mxu2  ;;  %2054 = vpow2.f32 %v1958_v42  ;;  %v376_v52 = vpop.f32.mrf.mxu0 }
  0xcd   :  { %v401_v48 = vadd.f32 %v400_v47, %v321_v13  ;;  %v413_v49 = vpop.f32.mrf.mxu3  ;;  %v389_v59 = vpop.f32.mrf.mxu1 }
  0xce   :  { %v414_v24 = vadd.f32 %v413_v49, %v334_v14 }
  0xcf   :  { %v428_v61 = vadd.f32 %v2545_v43, %v401_v48 }
  0xd0   :  { %v429_v36 = vadd.f32 %v2548_v26, %v414_v24 }
  0xd1   :  { %v1959_v1 = vmul.f32 -1.442695, %v428_v61  ;;  %v2053_v4 = vpop.eup %2052 }
  0xd2   :  { %v2055_v6 = vpop.eup %2054  ;;  %v439_v11 = vadd.f32 1.0, %v2053_v4 }
  0xd3   :  { %2056 = vpow2.f32 %v1959_v1  ;;  %v440_v18 = vadd.f32 1.0, %v2055_v6 }
  0xd4   :  { %v402_v19 = vpop.f32.mrf.mxu2  ;;  %2058 = vrcp.f32 %v439_v11  ;;  %v453_v48 = vand.u32 2147483648, %v439_v11  ;;  %v451_v61 = vand.u32 2147483647, %v439_v11  ;;  %vm447_vm4 = vweird.f32 %v439_v11 }
  0xd5   :  { %v415_v22 = vpop.f32.mrf.mxu3  ;;  %2060 = vrcp.f32 %v440_v18  ;;  %v468_v52 = vand.u32 2147483648, %v440_v18  ;;  %v466_v20 = vand.u32 2147483647, %v440_v18  ;;  %vm462_vm5 = vweird.f32 %v440_v18 }
  0xd6   :  { %v454_v6 = vor.u32 1.1754944e-38, %v453_v48  ;;  %vm452_vm8 = vcmp.eq.f32.partialorder %v451_v61, 8.507059e+37 }
  0xd7   :  { %v469_v22 = vor.u32 1.1754944e-38, %v468_v52  ;;  %vm467_vm9 = vcmp.eq.f32.partialorder %v466_v20, 8.507059e+37 }
  0xd9   :  { %v2057_v32 = vpop.eup %2056 }
  0xda   :  { %v441_v13 = vadd.f32 1.0, %v2057_v32  ;;  %v2059_v35 = vpop.eup %2058 }
  0xdb   :  { %v2061_v39 = vpop.eup %2060  ;;  %v443_v40 = vmul.f32 %v2059_v35, %v439_v11  ;;  %vm448_vm2 = vweird.f32 %v2059_v35 }
  0xdc   :  { %2062 = vrcp.f32 %v441_v13  ;;  %v458_v41 = vmul.f32 %v2061_v39, %v440_v18  ;;  %vm463_vm3 = vweird.f32 %v2061_v39  ;;  %vm449_vm6 = vmor %vm447_vm4, %vm448_vm2  ;;  %v483_v18 = vand.u32 2147483648, %v441_v13 }
  0xdd   :  { %v444_v42 = vsub.f32 1.0, %v443_v40  ;;  %2064 = vtanh.f32 %v429_v36  ;;  %vm464_vm7 = vmor %vm462_vm5, %vm463_vm3  ;;  %vm477_vm11 = vweird.f32 %v441_v13  ;;  %v481_v48 = vand.u32 2147483647, %v441_v13 }
  0xde   :  { %v459_v47 = vsub.f32 1.0, %v458_v41  ;;  %v484_v52 = vor.u32 1.1754944e-38, %v483_v18 }
  0xdf   :  { %v445_v59 = vmul.f32 %v2059_v35, %v444_v42  ;;  %vm482_vm13 = vcmp.eq.f32.partialorder %v481_v48, 8.507059e+37 }
  0xe0   :  { %v460_v14 = vmul.f32 %v2061_v39, %v459_v47 }
  0xe1   :  { %v446_v1 = vadd.f32 %v2059_v35, %v445_v59 }
  0xe2   :  { %v2063_v49 = vpop.eup %2062  ;;  %v461_v19 = vadd.f32 %v2061_v39, %v460_v14 }
  0xe3   :  { %v473_v4 = vmul.f32 %v2063_v49, %v441_v13  ;;  %v450_v24 = vsel %vm449_vm6, %v2059_v35, %v446_v1  ;;  %v2065_v32 = vpop.eup %2064  ;;  %vm478_vm10 = vweird.f32 %v2063_v49 }
  0xe4   :  { %v455_v40 = vsel %vm452_vm8, %v454_v6, %v450_v24  ;;  %v465_v41 = vsel %vm464_vm7, %v2061_v39, %v461_v19  ;;  %vm479_vm12 = vmor %vm477_vm11, %vm478_vm10 }
  0xe5   :  { %v474_v36 = vsub.f32 1.0, %v473_v4  ;;  %v470_v42 = vsel %vm467_vm9, %v469_v22, %v465_v41  ;;  %v489_v47 = vmul.f32 %v2065_v32, %v455_v40 }
  0xe6   :  { %v488_v26 = vmul.f32 0.0, %v470_v42 }
  0xe7   :  { %v475_v43 = vmul.f32 %v2063_v49, %v474_v36 }
  0xe8   :  { %v2551_v59 = vadd.f32 %v489_v47, %v488_v26 }
  0xe9   :  { %v476_v11 = vadd.f32 %v2063_v49, %v475_v43  ;;  %v501_v43 = vld [vmem:[#allocation2 + $0x4] sm:$0xf] }
  0xea   :  { %2066 = vtanh.f32 %v2551_v59 }
  0xeb   :  { %v480_v35 = vsel %vm479_vm12, %v2063_v49, %v476_v11 }
  0xec   :  { %v485_v39 = vsel %vm482_vm13, %v484_v52, %v480_v35 }
  0xf0   :  { %v2067_v61 = vpop.eup %2066 }
  0xf1   :  { %v492_v14 = vmul.f32 %v2067_v61, %v485_v39  ;;  %v2869_v39 = vld [vmem:[#allocation18_spill] sm:$0xff] }
  0xf3   :  { %v502_v20 = vpack.c.bf16 %v492_v14, %v492_v14 }
  0xf5   :  { %511 = vmatmul.bf16.vlgmr.msra.gmra.mxu0 %v502_v20  ;;  %524 = vmatmul.bf16.vlgmr.msra.gmra.mxu1 %v502_v20 }
  0xf6   :  { %537 = vmatmul.bf16.vlgmr.msra.gmra.mxu2 %v502_v20  ;;  %550 = vmatmul.bf16.vlgmr.msra.gmra.mxu3 %v502_v20 }
  0xf7   :  { %687 = vmatpush.bf16.msra.mxu0 %v2387_v3  ;;  %700 = vmatpush.bf16.msra.mxu1 %v2389_v7 }
  0xf8   :  { %713 = vmatpush.bf16.msra.mxu2 %v2391_v8  ;;  %726 = vmatpush.bf16.msra.mxu3 %v2394_v12 }
  0xfb   :  { %688 = vmatpush.bf16.msra.mxu0 %v2398_v16  ;;  %701 = vmatpush.bf16.msra.mxu1 %v2400_v17 }
  0xfc   :  { %714 = vmatpush.bf16.msra.mxu2 %v2403_v21  ;;  %727 = vmatpush.bf16.msra.mxu3 %v2405_v25 }
  0xff   :  { %689 = vmatpush.bf16.msra.mxu0 %v2408_v29  ;;  %702 = vmatpush.bf16.msra.mxu1 %v2412_v33 }
 0x100   :  { %715 = vmatpush.bf16.msra.mxu2 %v2414_v34  ;;  %728 = vmatpush.bf16.msra.mxu3 %v2417_v38 }
 0x103   :  { %690 = vmatpush.bf16.msra.mxu0 %v2420_v44  ;;  %703 = vmatpush.bf16.msra.mxu1 %v2424_v45 }
 0x104   :  { %716 = vmatpush.bf16.msra.mxu2 %v2426_v46  ;;  %729 = vmatpush.bf16.msra.mxu3 %v2429_v50 }
 0x105   :  { %1960 = vmatmul.msk.bf16.vlgmr.msrb.gmra.mxu0 %vm348_vm1, %v501_v43  ;;  %1961 = vmatmul.msk.bf16.vlgmr.msrb.gmra.mxu1 %vm348_vm1, %v501_v43 }
 0x106   :  { %1962 = vmatmul.msk.bf16.vlgmr.msrb.gmra.mxu2 %vm348_vm1, %v501_v43  ;;  %1963 = vmatmul.msk.bf16.vlgmr.msrb.gmra.mxu3 %vm348_vm1, %v501_v43 }
 0x107   :  { %691 = vmatpush.bf16.msra.mxu0 %v2432_v56  ;;  %704 = vmatpush.bf16.msra.mxu1 %v2436_v57 }
 0x108   :  { %717 = vmatpush.bf16.msra.mxu2 %v2438_v58  ;;  %730 = vmatpush.bf16.msra.mxu3 %v2441_v62 }
 0x10b   :  { %692 = vmatpush.bf16.msra.mxu0 %v2444_v5  ;;  %705 = vmatpush.bf16.msra.mxu1 %v2448_v9 }
 0x10c   :  { %718 = vmatpush.bf16.msra.mxu2 %v2450_v10  ;;  %731 = vmatpush.bf16.msra.mxu3 %v2453_v15 }
 0x10f   :  { %693 = vmatpush.bf16.msra.mxu0 %v2456_v27  ;;  %706 = vmatpush.bf16.msra.mxu1 %v2460_v30 }
 0x110   :  { %719 = vmatpush.bf16.msra.mxu2 %v2462_v31  ;;  %732 = vmatpush.bf16.msra.mxu3 %v2465_v37 }
 0x113   :  { %694 = vmatpush.bf16.msra.mxu0 %v2468_v51  ;;  %707 = vmatpush.bf16.msra.mxu1 %v2472_v53 }
 0x114   :  { %720 = vmatpush.bf16.msra.mxu2 %v2474_v54  ;;  %733 = vmatpush.bf16.msra.mxu3 %v2477_v55 }
 0x117   :  { %749 = vmatpush.bf16.msrb.mxu0 %v2480_v60  ;;  %762 = vmatpush.bf16.msrb.mxu1 %v2484_v63 }
 0x118   :  { %775 = vmatpush.bf16.msrb.mxu2 %v2491_v0  ;;  %788 = vmatpush.bf16.msrb.mxu3 %v2495_v2 }
 0x172   :  { %v512_v26 = vpop.f32.mrf.mxu0  ;;  %v525_v13 = vpop.f32.mrf.mxu1 }
 0x179   :  { %v538_v49 = vpop.f32.mrf.mxu2  ;;  %v551_v1 = vpop.f32.mrf.mxu3 }
 0x17a   :  { %v514_v4 = vpop.f32.mrf.mxu0  ;;  %v527_v6 = vpop.f32.mrf.mxu1 }
 0x181   :  { %v540_v19 = vpop.f32.mrf.mxu2  ;;  %v553_v22 = vpop.f32.mrf.mxu3 }
 0x182   :  { %v567_v24 = vpop.f32.mrf.mxu0  ;;  %v580_v32 = vpop.f32.mrf.mxu1 }
 0x183   :  { %v568_v36 = vadd.f32 %v567_v24, %v512_v26  ;;  %v581_v40 = vadd.f32 %v580_v32, %v525_v13 }
 0x185   :  { %v610_v41 = vadd.f32 %v568_v36, %v2539_v23  ;;  %v611_v42 = vadd.f32 %v581_v40, %v2541_v28  ;;  %v2870_v40 = vld [vmem:[#allocation19_spill] sm:$0xff] }
 0x187   :  { %v1964_v47 = vmul.f32 -1.442695, %v610_v41  ;;  %v1965_v11 = vmul.f32 -1.442695, %v611_v42 }
 0x189   :  { %2068 = vpow2.f32 %v1964_v47  ;;  %v593_v18 = vpop.f32.mrf.mxu2  ;;  %v606_v48 = vpop.f32.mrf.mxu3 }
 0x18a   :  { %2070 = vpow2.f32 %v1965_v11  ;;  %v594_v35 = vadd.f32 %v593_v18, %v538_v49  ;;  %v569_v52 = vpop.f32.mrf.mxu0  ;;  %v582_v61 = vpop.f32.mrf.mxu1  ;;  %v607_v22 = vadd.f32 %v606_v48, %v551_v1 }
 0x18c   :  { %v612_v14 = vadd.f32 %v594_v35, %v2869_v39  ;;  %v613_v49 = vadd.f32 %v607_v22, %v2870_v40 }
 0x18e   :  { %v1966_v20 = vmul.f32 -1.442695, %v612_v14 }
 0x18f   :  { %v2069_v43 = vpop.eup %2068 }
 0x190   :  { %v2071_v4 = vpop.eup %2070  ;;  %v623_v26 = vadd.f32 1.0, %v2069_v43  ;;  %2072 = vpow2.f32 %v1966_v20 }
 0x191   :  { %v624_v13 = vadd.f32 1.0, %v2071_v4  ;;  %v595_v6 = vpop.f32.mrf.mxu2  ;;  %v608_v19 = vpop.f32.mrf.mxu3 }
 0x192   :  { %2074 = vrcp.f32 %v623_v26  ;;  %v637_v35 = vand.u32 2147483648, %v623_v26  ;;  %v635_v14 = vand.u32 2147483647, %v623_v26  ;;  %vm631_vm0 = vweird.f32 %v623_v26 }
 0x193   :  { %2076 = vrcp.f32 %v624_v13  ;;  %v652_v52 = vand.u32 2147483648, %v624_v13  ;;  %v650_v1 = vand.u32 2147483647, %v624_v13  ;;  %vm646_vm2 = vweird.f32 %v624_v13 }
 0x194   :  { %v638_v6 = vor.u32 1.1754944e-38, %v637_v35  ;;  %vm636_vm5 = vcmp.eq.f32.partialorder %v635_v14, 8.507059e+37 }
 0x195   :  { %v653_v22 = vor.u32 1.1754944e-38, %v652_v52  ;;  %vm651_vm6 = vcmp.eq.f32.partialorder %v650_v1, 8.507059e+37 }
 0x196   :  { %v2073_v24 = vpop.eup %2072 }
 0x197   :  { %v625_v32 = vadd.f32 1.0, %v2073_v24 }
 0x198   :  { %v2075_v36 = vpop.eup %2074 }
 0x199   :  { %v2077_v41 = vpop.eup %2076  ;;  %v627_v42 = vmul.f32 %v2075_v36, %v623_v26  ;;  %2078 = vrcp.f32 %v625_v32  ;;  %vm632_vm14 = vweird.f32 %v2075_v36  ;;  %v667_v35 = vand.u32 2147483648, %v625_v32 }
 0x19a   :  { %v642_v47 = vmul.f32 %v2077_v41, %v624_v13  ;;  %2080 = vtanh.f32 %v613_v49  ;;  %vm647_vm15 = vweird.f32 %v2077_v41  ;;  %vm633_vm3 = vmor %vm631_vm0, %vm632_vm14  ;;  %vm661_vm8 = vweird.f32 %v625_v32 }
 0x19b   :  { %v628_v11 = vsub.f32 1.0, %v627_v42  ;;  %vm648_vm4 = vmor %vm646_vm2, %vm647_vm15  ;;  %v668_v14 = vor.u32 1.1754944e-38, %v667_v35 }
 0x19c   :  { %v643_v18 = vsub.f32 1.0, %v642_v47 }
 0x19d   :  { %v629_v61 = vmul.f32 %v2075_v36, %v628_v11 }
 0x19e   :  { %v644_v20 = vmul.f32 %v2077_v41, %v643_v18 }
 0x19f   :  { %v2079_v48 = vpop.eup %2078  ;;  %v630_v43 = vadd.f32 %v2075_v36, %v629_v61 }
 0x1a0   :  { %v657_v4 = vmul.f32 %v2079_v48, %v625_v32  ;;  %v645_v19 = vadd.f32 %v2077_v41, %v644_v20  ;;  %v2081_v49 = vpop.eup %2080  ;;  %vm662_vm7 = vweird.f32 %v2079_v48 }
 0x1a1   :  { %v634_v24 = vsel %vm633_vm3, %v2075_v36, %v630_v43  ;;  %v665_v36 = vand.u32 2147483647, %v625_v32  ;;  %vm663_vm9 = vmor %vm661_vm8, %vm662_vm7 }
 0x1a2   :  { %v658_v42 = vsub.f32 1.0, %v657_v4  ;;  %v639_v47 = vsel %vm636_vm5, %v638_v6, %v634_v24  ;;  %v649_v11 = vsel %vm648_vm4, %v2077_v41, %v645_v19 }
 0x1a3   :  { %v654_v18 = vsel %vm651_vm6, %v653_v22, %v649_v11  ;;  %v673_v40 = vmul.f32 %v2081_v49, %v639_v47  ;;  %vm666_vm10 = vcmp.eq.f32.partialorder %v665_v36, 8.507059e+37 }
 0x1a4   :  { %v672_v39 = vmul.f32 %v654_v18, %v2551_v59  ;;  %v659_v61 = vmul.f32 %v2079_v48, %v658_v42  ;;  %v685_v59 = vld [vmem:[#allocation2 + $0x8] sm:$0xf] }
 0x1a6   :  { %v2599_v26 = vadd.f32 %v673_v40, %v672_v39  ;;  %v660_v13 = vadd.f32 %v2079_v48, %v659_v61 }
 0x1a8   :  { %2082 = vtanh.f32 %v2599_v26  ;;  %v664_v52 = vsel %vm663_vm9, %v2079_v48, %v660_v13 }
 0x1a9   :  { %v669_v20 = vsel %vm666_vm10, %v668_v14, %v664_v52 }
 0x1ae   :  { %v2083_v41 = vpop.eup %2082 }
 0x1af   :  { %v676_v1 = vmul.f32 %v2083_v41, %v669_v20  ;;  %v2871_v20 = vld [vmem:[#allocation18_spill] sm:$0xff] }
 0x1b1   :  { %v686_v43 = vpack.c.bf16 %v676_v1, %v676_v1 }
 0x1b3   :  { %695 = vmatmul.bf16.vlgmr.msra.gmra.mxu0 %v686_v43  ;;  %708 = vmatmul.bf16.vlgmr.msra.gmra.mxu1 %v686_v43 }
 0x1b4   :  { %721 = vmatmul.bf16.vlgmr.msra.gmra.mxu2 %v686_v43  ;;  %734 = vmatmul.bf16.vlgmr.msra.gmra.mxu3 %v686_v43 }
 0x1b5   :  { %871 = vmatpush.bf16.msra.mxu0 %v2387_v3  ;;  %884 = vmatpush.bf16.msra.mxu1 %v2389_v7 }
 0x1b6   :  { %897 = vmatpush.bf16.msra.mxu2 %v2391_v8  ;;  %910 = vmatpush.bf16.msra.mxu3 %v2394_v12 }
 0x1b9   :  { %872 = vmatpush.bf16.msra.mxu0 %v2398_v16  ;;  %885 = vmatpush.bf16.msra.mxu1 %v2400_v17 }
 0x1ba   :  { %898 = vmatpush.bf16.msra.mxu2 %v2403_v21  ;;  %911 = vmatpush.bf16.msra.mxu3 %v2405_v25 }
 0x1bd   :  { %873 = vmatpush.bf16.msra.mxu0 %v2408_v29  ;;  %886 = vmatpush.bf16.msra.mxu1 %v2412_v33 }
 0x1be   :  { %899 = vmatpush.bf16.msra.mxu2 %v2414_v34  ;;  %912 = vmatpush.bf16.msra.mxu3 %v2417_v38 }
 0x1c1   :  { %874 = vmatpush.bf16.msra.mxu0 %v2420_v44  ;;  %887 = vmatpush.bf16.msra.mxu1 %v2424_v45 }
 0x1c2   :  { %900 = vmatpush.bf16.msra.mxu2 %v2426_v46  ;;  %913 = vmatpush.bf16.msra.mxu3 %v2429_v50 }
 0x1c3   :  { %1967 = vmatmul.msk.bf16.vlgmr.msrb.gmra.mxu0 %vm348_vm1, %v685_v59  ;;  %1968 = vmatmul.msk.bf16.vlgmr.msrb.gmra.mxu1 %vm348_vm1, %v685_v59 }
 0x1c4   :  { %1969 = vmatmul.msk.bf16.vlgmr.msrb.gmra.mxu2 %vm348_vm1, %v685_v59  ;;  %1970 = vmatmul.msk.bf16.vlgmr.msrb.gmra.mxu3 %vm348_vm1, %v685_v59 }
 0x1c5   :  { %875 = vmatpush.bf16.msra.mxu0 %v2432_v56  ;;  %888 = vmatpush.bf16.msra.mxu1 %v2436_v57 }
 0x1c6   :  { %901 = vmatpush.bf16.msra.mxu2 %v2438_v58  ;;  %914 = vmatpush.bf16.msra.mxu3 %v2441_v62 }
 0x1c9   :  { %876 = vmatpush.bf16.msra.mxu0 %v2444_v5  ;;  %889 = vmatpush.bf16.msra.mxu1 %v2448_v9 }
 0x1ca   :  { %902 = vmatpush.bf16.msra.mxu2 %v2450_v10  ;;  %915 = vmatpush.bf16.msra.mxu3 %v2453_v15 }
 0x1cd   :  { %877 = vmatpush.bf16.msra.mxu0 %v2456_v27  ;;  %890 = vmatpush.bf16.msra.mxu1 %v2460_v30 }
 0x1ce   :  { %903 = vmatpush.bf16.msra.mxu2 %v2462_v31  ;;  %916 = vmatpush.bf16.msra.mxu3 %v2465_v37 }
 0x1d1   :  { %878 = vmatpush.bf16.msra.mxu0 %v2468_v51  ;;  %891 = vmatpush.bf16.msra.mxu1 %v2472_v53 }
 0x1d2   :  { %904 = vmatpush.bf16.msra.mxu2 %v2474_v54  ;;  %917 = vmatpush.bf16.msra.mxu3 %v2477_v55 }
 0x1d5   :  { %933 = vmatpush.bf16.msrb.mxu0 %v2480_v60  ;;  %946 = vmatpush.bf16.msrb.mxu1 %v2484_v63 }
 0x1d6   :  { %959 = vmatpush.bf16.msrb.mxu2 %v2491_v0  ;;  %972 = vmatpush.bf16.msrb.mxu3 %v2495_v2 }
 0x230   :  { %v696_v39 = vpop.f32.mrf.mxu0  ;;  %v709_v32 = vpop.f32.mrf.mxu1 }
 0x237   :  { %v722_v40 = vpop.f32.mrf.mxu2  ;;  %v735_v48 = vpop.f32.mrf.mxu3 }
 0x238   :  { %v698_v4 = vpop.f32.mrf.mxu0  ;;  %v711_v6 = vpop.f32.mrf.mxu1 }
 0x23f   :  { %v724_v19 = vpop.f32.mrf.mxu2  ;;  %v737_v22 = vpop.f32.mrf.mxu3 }
 0x240   :  { %v751_v24 = vpop.f32.mrf.mxu0  ;;  %v764_v49 = vpop.f32.mrf.mxu1 }
 0x241   :  { %v752_v42 = vadd.f32 %v751_v24, %v696_v39  ;;  %v765_v47 = vadd.f32 %v764_v49, %v709_v32 }
 0x243   :  { %v794_v11 = vadd.f32 %v752_v42, %v2539_v23  ;;  %v795_v18 = vadd.f32 %v765_v47, %v2541_v28  ;;  %v2872_v47 = vld [vmem:[#allocation19_spill] sm:$0xff] }
 0x245   :  { %v1971_v61 = vmul.f32 -1.442695, %v794_v11  ;;  %v1972_v13 = vmul.f32 -1.442695, %v795_v18 }
 0x247   :  { %2084 = vpow2.f32 %v1971_v61  ;;  %v777_v35 = vpop.f32.mrf.mxu2  ;;  %v790_v36 = vpop.f32.mrf.mxu3 }
 0x248   :  { %2086 = vpow2.f32 %v1972_v13  ;;  %v778_v52 = vadd.f32 %v777_v35, %v722_v40  ;;  %v753_v14 = vpop.f32.mrf.mxu0  ;;  %v766_v41 = vpop.f32.mrf.mxu1  ;;  %v791_v22 = vadd.f32 %v790_v36, %v735_v48 }
 0x24a   :  { %v796_v1 = vadd.f32 %v778_v52, %v2871_v20  ;;  %v797_v40 = vadd.f32 %v791_v22, %v2872_v47 }
 0x24c   :  { %v1973_v43 = vmul.f32 -1.442695, %v796_v1 }
 0x24d   :  { %v2085_v59 = vpop.eup %2084 }
 0x24e   :  { %v2087_v4 = vpop.eup %2086  ;;  %v807_v39 = vadd.f32 1.0, %v2085_v59  ;;  %2088 = vpow2.f32 %v1973_v43 }
 0x24f   :  { %v808_v32 = vadd.f32 1.0, %v2087_v4  ;;  %v779_v6 = vpop.f32.mrf.mxu2  ;;  %v792_v19 = vpop.f32.mrf.mxu3 }
 0x250   :  { %2090 = vrcp.f32 %v807_v39  ;;  %v821_v52 = vand.u32 2147483648, %v807_v39  ;;  %v819_v1 = vand.u32 2147483647, %v807_v39  ;;  %vm815_vm13 = vweird.f32 %v807_v39 }
 0x251   :  { %2092 = vrcp.f32 %v808_v32  ;;  %v836_v14 = vand.u32 2147483648, %v808_v32  ;;  %v834_v48 = vand.u32 2147483647, %v808_v32  ;;  %vm830_vm14 = vweird.f32 %v808_v32 }
 0x252   :  { %v822_v6 = vor.u32 1.1754944e-38, %v821_v52  ;;  %vm820_vm2 = vcmp.eq.f32.partialorder %v819_v1, 8.507059e+37 }
 0x253   :  { %v837_v22 = vor.u32 1.1754944e-38, %v836_v14  ;;  %vm835_vm3 = vcmp.eq.f32.partialorder %v834_v48, 8.507059e+37 }
 0x254   :  { %v2089_v24 = vpop.eup %2088 }
 0x255   :  { %v809_v49 = vadd.f32 1.0, %v2089_v24 }
 0x256   :  { %v2091_v42 = vpop.eup %2090 }
 0x257   :  { %v2093_v11 = vpop.eup %2092  ;;  %v811_v18 = vmul.f32 %v2091_v42, %v807_v39  ;;  %2094 = vrcp.f32 %v809_v49  ;;  %vm816_vm11 = vweird.f32 %v2091_v42  ;;  %v851_v52 = vand.u32 2147483648, %v809_v49 }
 0x258   :  { %v826_v61 = vmul.f32 %v2093_v11, %v808_v32  ;;  %2096 = vtanh.f32 %v797_v40  ;;  %vm831_vm12 = vweird.f32 %v2093_v11  ;;  %vm817_vm15 = vmor %vm815_vm13, %vm816_vm11  ;;  %vm845_vm5 = vweird.f32 %v809_v49 }
 0x259   :  { %v812_v13 = vsub.f32 1.0, %v811_v18  ;;  %vm832_vm0 = vmor %vm830_vm14, %vm831_vm12  ;;  %v852_v1 = vor.u32 1.1754944e-38, %v851_v52 }
 0x25a   :  { %v827_v35 = vsub.f32 1.0, %v826_v61 }
 0x25b   :  { %v813_v41 = vmul.f32 %v2091_v42, %v812_v13 }
 0x25c   :  { %v828_v43 = vmul.f32 %v2093_v11, %v827_v35 }
 0x25d   :  { %v2095_v36 = vpop.eup %2094  ;;  %v814_v59 = vadd.f32 %v2091_v42, %v813_v41 }
 0x25e   :  { %v841_v4 = vmul.f32 %v2095_v36, %v809_v49  ;;  %v829_v19 = vadd.f32 %v2093_v11, %v828_v43  ;;  %v2097_v40 = vpop.eup %2096  ;;  %vm846_vm4 = vweird.f32 %v2095_v36 }
 0x25f   :  { %v818_v24 = vsel %vm817_vm15, %v2091_v42, %v814_v59  ;;  %v849_v42 = vand.u32 2147483647, %v809_v49  ;;  %vm847_vm6 = vmor %vm845_vm5, %vm846_vm4 }
 0x260   :  { %v842_v18 = vsub.f32 1.0, %v841_v4  ;;  %v823_v61 = vsel %vm820_vm2, %v822_v6, %v818_v24  ;;  %v833_v13 = vsel %vm832_vm0, %v2093_v11, %v829_v19 }
 0x261   :  { %v838_v35 = vsel %vm835_vm3, %v837_v22, %v833_v13  ;;  %v857_v47 = vmul.f32 %v2097_v40, %v823_v61  ;;  %vm850_vm7 = vcmp.eq.f32.partialorder %v849_v42, 8.507059e+37 }
 0x262   :  { %v856_v20 = vmul.f32 %v838_v35, %v2599_v26  ;;  %v843_v41 = vmul.f32 %v2095_v36, %v842_v18  ;;  %v869_v26 = vld [vmem:[#allocation2 + $0xc] sm:$0xf] }
 0x264   :  { %v2647_v39 = vadd.f32 %v857_v47, %v856_v20  ;;  %v844_v32 = vadd.f32 %v2095_v36, %v843_v41 }
 0x266   :  { %2098 = vtanh.f32 %v2647_v39  ;;  %v848_v14 = vsel %vm847_vm6, %v2095_v36, %v844_v32 }
 0x267   :  { %v853_v43 = vsel %vm850_vm7, %v852_v1, %v848_v14 }
 0x26c   :  { %v2099_v11 = vpop.eup %2098 }
 0x26d   :  { %v860_v48 = vmul.f32 %v2099_v11, %v853_v43  ;;  %v2873_v43 = vld [vmem:[#allocation18_spill] sm:$0xff] }
 0x26f   :  { %v870_v59 = vpack.c.bf16 %v860_v48, %v860_v48 }
 0x271   :  { %879 = vmatmul.bf16.vlgmr.msra.gmra.mxu0 %v870_v59  ;;  %892 = vmatmul.bf16.vlgmr.msra.gmra.mxu1 %v870_v59 }
 0x272   :  { %905 = vmatmul.bf16.vlgmr.msra.gmra.mxu2 %v870_v59  ;;  %918 = vmatmul.bf16.vlgmr.msra.gmra.mxu3 %v870_v59 }
 0x273   :  { %1055 = vmatpush.bf16.msra.mxu0 %v2387_v3  ;;  %1068 = vmatpush.bf16.msra.mxu1 %v2389_v7 }
 0x274   :  { %1081 = vmatpush.bf16.msra.mxu2 %v2391_v8  ;;  %1094 = vmatpush.bf16.msra.mxu3 %v2394_v12 }
 0x277   :  { %1056 = vmatpush.bf16.msra.mxu0 %v2398_v16  ;;  %1069 = vmatpush.bf16.msra.mxu1 %v2400_v17 }
 0x278   :  { %1082 = vmatpush.bf16.msra.mxu2 %v2403_v21  ;;  %1095 = vmatpush.bf16.msra.mxu3 %v2405_v25 }
 0x27b   :  { %1057 = vmatpush.bf16.msra.mxu0 %v2408_v29  ;;  %1070 = vmatpush.bf16.msra.mxu1 %v2412_v33 }
 0x27c   :  { %1083 = vmatpush.bf16.msra.mxu2 %v2414_v34  ;;  %1096 = vmatpush.bf16.msra.mxu3 %v2417_v38 }
 0x27f   :  { %1058 = vmatpush.bf16.msra.mxu0 %v2420_v44  ;;  %1071 = vmatpush.bf16.msra.mxu1 %v2424_v45 }
 0x280   :  { %1084 = vmatpush.bf16.msra.mxu2 %v2426_v46  ;;  %1097 = vmatpush.bf16.msra.mxu3 %v2429_v50 }
 0x281   :  { %1974 = vmatmul.msk.bf16.vlgmr.msrb.gmra.mxu0 %vm348_vm1, %v869_v26  ;;  %1975 = vmatmul.msk.bf16.vlgmr.msrb.gmra.mxu1 %vm348_vm1, %v869_v26 }
 0x282   :  { %1976 = vmatmul.msk.bf16.vlgmr.msrb.gmra.mxu2 %vm348_vm1, %v869_v26  ;;  %1977 = vmatmul.msk.bf16.vlgmr.msrb.gmra.mxu3 %vm348_vm1, %v869_v26 }
 0x283   :  { %1059 = vmatpush.bf16.msra.mxu0 %v2432_v56  ;;  %1072 = vmatpush.bf16.msra.mxu1 %v2436_v57 }
 0x284   :  { %1085 = vmatpush.bf16.msra.mxu2 %v2438_v58  ;;  %1098 = vmatpush.bf16.msra.mxu3 %v2441_v62 }
 0x287   :  { %1060 = vmatpush.bf16.msra.mxu0 %v2444_v5  ;;  %1073 = vmatpush.bf16.msra.mxu1 %v2448_v9 }
 0x288   :  { %1086 = vmatpush.bf16.msra.mxu2 %v2450_v10  ;;  %1099 = vmatpush.bf16.msra.mxu3 %v2453_v15 }
 0x28b   :  { %1061 = vmatpush.bf16.msra.mxu0 %v2456_v27  ;;  %1074 = vmatpush.bf16.msra.mxu1 %v2460_v30 }
 0x28c   :  { %1087 = vmatpush.bf16.msra.mxu2 %v2462_v31  ;;  %1100 = vmatpush.bf16.msra.mxu3 %v2465_v37 }
 0x28f   :  { %1062 = vmatpush.bf16.msra.mxu0 %v2468_v51  ;;  %1075 = vmatpush.bf16.msra.mxu1 %v2472_v53 }
 0x290   :  { %1088 = vmatpush.bf16.msra.mxu2 %v2474_v54  ;;  %1101 = vmatpush.bf16.msra.mxu3 %v2477_v55 }
 0x293   :  { %1117 = vmatpush.bf16.msrb.mxu0 %v2480_v60  ;;  %1130 = vmatpush.bf16.msrb.mxu1 %v2484_v63 }
 0x294   :  { %1143 = vmatpush.bf16.msrb.mxu2 %v2491_v0  ;;  %1156 = vmatpush.bf16.msrb.mxu3 %v2495_v2 }
 0x2ee   :  { %v880_v20 = vpop.f32.mrf.mxu0  ;;  %v893_v49 = vpop.f32.mrf.mxu1 }
 0x2f5   :  { %v906_v47 = vpop.f32.mrf.mxu2  ;;  %v919_v36 = vpop.f32.mrf.mxu3 }
 0x2f6   :  { %v882_v4 = vpop.f32.mrf.mxu0  ;;  %v895_v6 = vpop.f32.mrf.mxu1 }
 0x2fd   :  { %v908_v19 = vpop.f32.mrf.mxu2  ;;  %v921_v22 = vpop.f32.mrf.mxu3 }
 0x2fe   :  { %v935_v24 = vpop.f32.mrf.mxu0  ;;  %v948_v40 = vpop.f32.mrf.mxu1 }
 0x2ff   :  { %v936_v18 = vadd.f32 %v935_v24, %v880_v20  ;;  %v949_v61 = vadd.f32 %v948_v40, %v893_v49 }
 0x301   :  { %v978_v13 = vadd.f32 %v936_v18, %v2539_v23  ;;  %v979_v35 = vadd.f32 %v949_v61, %v2541_v28  ;;  %v2874_v61 = vld [vmem:[#allocation19_spill] sm:$0xff] }
 0x303   :  { %v1978_v41 = vmul.f32 -1.442695, %v978_v13  ;;  %v1979_v32 = vmul.f32 -1.442695, %v979_v35 }
 0x305   :  { %2100 = vpow2.f32 %v1978_v41  ;;  %v961_v52 = vpop.f32.mrf.mxu2  ;;  %v974_v42 = vpop.f32.mrf.mxu3 }
 0x306   :  { %2102 = vpow2.f32 %v1979_v32  ;;  %v962_v14 = vadd.f32 %v961_v52, %v906_v47  ;;  %v937_v1 = vpop.f32.mrf.mxu0  ;;  %v950_v11 = vpop.f32.mrf.mxu1  ;;  %v975_v22 = vadd.f32 %v974_v42, %v919_v36 }
 0x308   :  { %v980_v48 = vadd.f32 %v962_v14, %v2873_v43  ;;  %v981_v47 = vadd.f32 %v975_v22, %v2874_v61 }
 0x30a   :  { %v1980_v59 = vmul.f32 -1.442695, %v980_v48 }
 0x30b   :  { %v2101_v26 = vpop.eup %2100 }
 0x30c   :  { %v2103_v4 = vpop.eup %2102  ;;  %v991_v20 = vadd.f32 1.0, %v2101_v26  ;;  %2104 = vpow2.f32 %v1980_v59 }
 0x30d   :  { %v992_v49 = vadd.f32 1.0, %v2103_v4  ;;  %v963_v6 = vpop.f32.mrf.mxu2  ;;  %v976_v19 = vpop.f32.mrf.mxu3 }
 0x30e   :  { %2106 = vrcp.f32 %v991_v20  ;;  %v1005_v14 = vand.u32 2147483648, %v991_v20  ;;  %v1003_v48 = vand.u32 2147483647, %v991_v20  ;;  %vm999_vm10 = vweird.f32 %v991_v20 }
 0x30f   :  { %2108 = vrcp.f32 %v992_v49  ;;  %v1020_v1 = vand.u32 2147483648, %v992_v49  ;;  %v1018_v36 = vand.u32 2147483647, %v992_v49  ;;  %vm1014_vm11 = vweird.f32 %v992_v49 }
 0x310   :  { %v1006_v6 = vor.u32 1.1754944e-38, %v1005_v14  ;;  %vm1004_vm14 = vcmp.eq.f32.partialorder %v1003_v48, 8.507059e+37 }
 0x311   :  { %v1021_v22 = vor.u32 1.1754944e-38, %v1020_v1  ;;  %vm1019_vm15 = vcmp.eq.f32.partialorder %v1018_v36, 8.507059e+37 }
 0x312   :  { %v2105_v24 = vpop.eup %2104 }
 0x313   :  { %v993_v40 = vadd.f32 1.0, %v2105_v24 }
 0x314   :  { %v2107_v18 = vpop.eup %2106 }
 0x315   :  { %v2109_v13 = vpop.eup %2108  ;;  %v995_v35 = vmul.f32 %v2107_v18, %v991_v20  ;;  %2110 = vrcp.f32 %v993_v40  ;;  %vm1000_vm8 = vweird.f32 %v2107_v18  ;;  %v1035_v14 = vand.u32 2147483648, %v993_v40 }
 0x316   :  { %v1010_v41 = vmul.f32 %v2109_v13, %v992_v49  ;;  %2112 = vtanh.f32 %v981_v47  ;;  %vm1015_vm9 = vweird.f32 %v2109_v13  ;;  %vm1001_vm12 = vmor %vm999_vm10, %vm1000_vm8  ;;  %vm1029_vm2 = vweird.f32 %v993_v40 }
 0x317   :  { %v996_v32 = vsub.f32 1.0, %v995_v35  ;;  %vm1016_vm13 = vmor %vm1014_vm11, %vm1015_vm9  ;;  %v1036_v48 = vor.u32 1.1754944e-38, %v1035_v14 }
 0x318   :  { %v1011_v52 = vsub.f32 1.0, %v1010_v41 }
 0x319   :  { %v997_v11 = vmul.f32 %v2107_v18, %v996_v32 }
 0x31a   :  { %v1012_v59 = vmul.f32 %v2109_v13, %v1011_v52 }
 0x31b   :  { %v2111_v42 = vpop.eup %2110  ;;  %v998_v26 = vadd.f32 %v2107_v18, %v997_v11 }
 0x31c   :  { %v1025_v4 = vmul.f32 %v2111_v42, %v993_v40  ;;  %v1013_v19 = vadd.f32 %v2109_v13, %v1012_v59  ;;  %v2113_v47 = vpop.eup %2112  ;;  %vm1030_vm0 = vweird.f32 %v2111_v42 }
 0x31d   :  { %v1002_v24 = vsel %vm1001_vm12, %v2107_v18, %v998_v26  ;;  %v1033_v18 = vand.u32 2147483647, %v993_v40  ;;  %vm1031_vm3 = vmor %vm1029_vm2, %vm1030_vm0 }
 0x31e   :  { %v1026_v35 = vsub.f32 1.0, %v1025_v4  ;;  %v1007_v41 = vsel %vm1004_vm14, %v1006_v6, %v1002_v24  ;;  %v1017_v32 = vsel %vm1016_vm13, %v2109_v13, %v1013_v19 }
 0x31f   :  { %v1022_v52 = vsel %vm1019_vm15, %v1021_v22, %v1017_v32  ;;  %v1041_v61 = vmul.f32 %v2113_v47, %v1007_v41  ;;  %vm1034_vm4 = vcmp.eq.f32.partialorder %v1033_v18, 8.507059e+37 }
 0x320   :  { %v1040_v43 = vmul.f32 %v1022_v52, %v2647_v39  ;;  %v1027_v11 = vmul.f32 %v2111_v42, %v1026_v35  ;;  %v1053_v39 = vld [vmem:[#allocation2 + $0x10] sm:$0xf] }
 0x322   :  { %v2695_v20 = vadd.f32 %v1041_v61, %v1040_v43  ;;  %v1028_v49 = vadd.f32 %v2111_v42, %v1027_v11 }
 0x324   :  { %2114 = vtanh.f32 %v2695_v20  ;;  %v1032_v1 = vsel %vm1031_vm3, %v2111_v42, %v1028_v49 }
 0x325   :  { %v1037_v59 = vsel %vm1034_vm4, %v1036_v48, %v1032_v1 }
 0x32a   :  { %v2115_v13 = vpop.eup %2114 }
 0x32b   :  { %v1044_v36 = vmul.f32 %v2115_v13, %v1037_v59  ;;  %v2875_v59 = vld [vmem:[#allocation18_spill] sm:$0xff] }
 0x32d   :  { %v1054_v26 = vpack.c.bf16 %v1044_v36, %v1044_v36 }
 0x32f   :  { %1063 = vmatmul.bf16.vlgmr.msra.gmra.mxu0 %v1054_v26  ;;  %1076 = vmatmul.bf16.vlgmr.msra.gmra.mxu1 %v1054_v26 }
 0x330   :  { %1089 = vmatmul.bf16.vlgmr.msra.gmra.mxu2 %v1054_v26  ;;  %1102 = vmatmul.bf16.vlgmr.msra.gmra.mxu3 %v1054_v26 }
 0x331   :  { %1239 = vmatpush.bf16.msra.mxu0 %v2387_v3  ;;  %1252 = vmatpush.bf16.msra.mxu1 %v2389_v7 }
 0x332   :  { %1265 = vmatpush.bf16.msra.mxu2 %v2391_v8  ;;  %1278 = vmatpush.bf16.msra.mxu3 %v2394_v12 }
 0x335   :  { %1240 = vmatpush.bf16.msra.mxu0 %v2398_v16  ;;  %1253 = vmatpush.bf16.msra.mxu1 %v2400_v17 }
 0x336   :  { %1266 = vmatpush.bf16.msra.mxu2 %v2403_v21  ;;  %1279 = vmatpush.bf16.msra.mxu3 %v2405_v25 }
 0x339   :  { %1241 = vmatpush.bf16.msra.mxu0 %v2408_v29  ;;  %1254 = vmatpush.bf16.msra.mxu1 %v2412_v33 }
 0x33a   :  { %1267 = vmatpush.bf16.msra.mxu2 %v2414_v34  ;;  %1280 = vmatpush.bf16.msra.mxu3 %v2417_v38 }
 0x33d   :  { %1242 = vmatpush.bf16.msra.mxu0 %v2420_v44  ;;  %1255 = vmatpush.bf16.msra.mxu1 %v2424_v45 }
 0x33e   :  { %1268 = vmatpush.bf16.msra.mxu2 %v2426_v46  ;;  %1281 = vmatpush.bf16.msra.mxu3 %v2429_v50 }
 0x33f   :  { %1981 = vmatmul.msk.bf16.vlgmr.msrb.gmra.mxu0 %vm348_vm1, %v1053_v39  ;;  %1982 = vmatmul.msk.bf16.vlgmr.msrb.gmra.mxu1 %vm348_vm1, %v1053_v39 }
 0x340   :  { %1983 = vmatmul.msk.bf16.vlgmr.msrb.gmra.mxu2 %vm348_vm1, %v1053_v39  ;;  %1984 = vmatmul.msk.bf16.vlgmr.msrb.gmra.mxu3 %vm348_vm1, %v1053_v39 }
 0x341   :  { %1243 = vmatpush.bf16.msra.mxu0 %v2432_v56  ;;  %1256 = vmatpush.bf16.msra.mxu1 %v2436_v57 }
 0x342   :  { %1269 = vmatpush.bf16.msra.mxu2 %v2438_v58  ;;  %1282 = vmatpush.bf16.msra.mxu3 %v2441_v62 }
 0x345   :  { %1244 = vmatpush.bf16.msra.mxu0 %v2444_v5  ;;  %1257 = vmatpush.bf16.msra.mxu1 %v2448_v9 }
 0x346   :  { %1270 = vmatpush.bf16.msra.mxu2 %v2450_v10  ;;  %1283 = vmatpush.bf16.msra.mxu3 %v2453_v15 }
 0x349   :  { %1245 = vmatpush.bf16.msra.mxu0 %v2456_v27  ;;  %1258 = vmatpush.bf16.msra.mxu1 %v2460_v30 }
 0x34a   :  { %1271 = vmatpush.bf16.msra.mxu2 %v2462_v31  ;;  %1284 = vmatpush.bf16.msra.mxu3 %v2465_v37 }
 0x34d   :  { %1246 = vmatpush.bf16.msra.mxu0 %v2468_v51  ;;  %1259 = vmatpush.bf16.msra.mxu1 %v2472_v53 }
 0x34e   :  { %1272 = vmatpush.bf16.msra.mxu2 %v2474_v54  ;;  %1285 = vmatpush.bf16.msra.mxu3 %v2477_v55 }
 0x351   :  { %1301 = vmatpush.bf16.msrb.mxu0 %v2480_v60  ;;  %1314 = vmatpush.bf16.msrb.mxu1 %v2484_v63 }
 0x352   :  { %1327 = vmatpush.bf16.msrb.mxu2 %v2491_v0  ;;  %1340 = vmatpush.bf16.msrb.mxu3 %v2495_v2 }
 0x3ac   :  { %v1064_v43 = vpop.f32.mrf.mxu0  ;;  %v1077_v40 = vpop.f32.mrf.mxu1 }
 0x3b3   :  { %v1090_v61 = vpop.f32.mrf.mxu2  ;;  %v1103_v42 = vpop.f32.mrf.mxu3 }
 0x3b4   :  { %v1066_v4 = vpop.f32.mrf.mxu0  ;;  %v1079_v6 = vpop.f32.mrf.mxu1 }
 0x3bb   :  { %v1092_v19 = vpop.f32.mrf.mxu2  ;;  %v1105_v22 = vpop.f32.mrf.mxu3 }
 0x3bc   :  { %v1119_v24 = vpop.f32.mrf.mxu0  ;;  %v1132_v47 = vpop.f32.mrf.mxu1 }
 0x3bd   :  { %v1120_v35 = vadd.f32 %v1119_v24, %v1064_v43  ;;  %v1133_v41 = vadd.f32 %v1132_v47, %v1077_v40 }
 0x3bf   :  { %v1162_v32 = vadd.f32 %v1120_v35, %v2539_v23  ;;  %v1163_v52 = vadd.f32 %v1133_v41, %v2541_v28  ;;  %v2876_v41 = vld [vmem:[#allocation19_spill] sm:$0xff] }
 0x3c1   :  { %v1985_v11 = vmul.f32 -1.442695, %v1162_v32  ;;  %v1986_v49 = vmul.f32 -1.442695, %v1163_v52 }
 0x3c3   :  { %2116 = vpow2.f32 %v1985_v11  ;;  %v1145_v14 = vpop.f32.mrf.mxu2  ;;  %v1158_v18 = vpop.f32.mrf.mxu3 }
 0x3c4   :  { %2118 = vpow2.f32 %v1986_v49  ;;  %v1146_v1 = vadd.f32 %v1145_v14, %v1090_v61  ;;  %v1121_v48 = vpop.f32.mrf.mxu0  ;;  %v1134_v13 = vpop.f32.mrf.mxu1  ;;  %v1159_v22 = vadd.f32 %v1158_v18, %v1103_v42 }
 0x3c6   :  { %v1164_v36 = vadd.f32 %v1146_v1, %v2875_v59  ;;  %v1165_v61 = vadd.f32 %v1159_v22, %v2876_v41 }
 0x3c8   :  { %v1987_v26 = vmul.f32 -1.442695, %v1164_v36 }
 0x3c9   :  { %v2117_v39 = vpop.eup %2116 }
 0x3ca   :  { %v2119_v4 = vpop.eup %2118  ;;  %v1175_v43 = vadd.f32 1.0, %v2117_v39  ;;  %2120 = vpow2.f32 %v1987_v26 }
 0x3cb   :  { %v1176_v40 = vadd.f32 1.0, %v2119_v4  ;;  %v1147_v6 = vpop.f32.mrf.mxu2  ;;  %v1160_v19 = vpop.f32.mrf.mxu3 }
 0x3cc   :  { %2122 = vrcp.f32 %v1175_v43  ;;  %v1189_v1 = vand.u32 2147483648, %v1175_v43  ;;  %v1187_v36 = vand.u32 2147483647, %v1175_v43  ;;  %vm1183_vm7 = vweird.f32 %v1175_v43 }
 0x3cd   :  { %2124 = vrcp.f32 %v1176_v40  ;;  %v1204_v48 = vand.u32 2147483648, %v1176_v40  ;;  %v1202_v42 = vand.u32 2147483647, %v1176_v40  ;;  %vm1198_vm8 = vweird.f32 %v1176_v40 }
 0x3ce   :  { %v1190_v6 = vor.u32 1.1754944e-38, %v1189_v1  ;;  %vm1188_vm11 = vcmp.eq.f32.partialorder %v1187_v36, 8.507059e+37 }
 0x3cf   :  { %v1205_v22 = vor.u32 1.1754944e-38, %v1204_v48  ;;  %vm1203_vm12 = vcmp.eq.f32.partialorder %v1202_v42, 8.507059e+37 }
 0x3d0   :  { %v2121_v24 = vpop.eup %2120 }
 0x3d1   :  { %v1177_v47 = vadd.f32 1.0, %v2121_v24 }
 0x3d2   :  { %v2123_v35 = vpop.eup %2122 }
 0x3d3   :  { %v2125_v32 = vpop.eup %2124  ;;  %v1179_v52 = vmul.f32 %v2123_v35, %v1175_v43  ;;  %2126 = vrcp.f32 %v1177_v47  ;;  %vm1184_vm5 = vweird.f32 %v2123_v35  ;;  %v1219_v1 = vand.u32 2147483648, %v1177_v47 }
 0x3d4   :  { %v1194_v11 = vmul.f32 %v2125_v32, %v1176_v40  ;;  %2128 = vtanh.f32 %v1165_v61  ;;  %vm1199_vm6 = vweird.f32 %v2125_v32  ;;  %vm1185_vm9 = vmor %vm1183_vm7, %vm1184_vm5  ;;  %vm1213_vm14 = vweird.f32 %v1177_v47 }
 0x3d5   :  { %v1180_v49 = vsub.f32 1.0, %v1179_v52  ;;  %vm1200_vm10 = vmor %vm1198_vm8, %vm1199_vm6  ;;  %v1220_v36 = vor.u32 1.1754944e-38, %v1219_v1 }
 0x3d6   :  { %v1195_v14 = vsub.f32 1.0, %v1194_v11 }
 0x3d7   :  { %v1181_v13 = vmul.f32 %v2123_v35, %v1180_v49 }
 0x3d8   :  { %v1196_v26 = vmul.f32 %v2125_v32, %v1195_v14 }
 0x3d9   :  { %v2127_v18 = vpop.eup %2126  ;;  %v1182_v39 = vadd.f32 %v2123_v35, %v1181_v13 }
 0x3da   :  { %v1209_v4 = vmul.f32 %v2127_v18, %v1177_v47  ;;  %v1197_v19 = vadd.f32 %v2125_v32, %v1196_v26  ;;  %v2129_v61 = vpop.eup %2128  ;;  %vm1214_vm13 = vweird.f32 %v2127_v18 }
 0x3db   :  { %v1186_v24 = vsel %vm1185_vm9, %v2123_v35, %v1182_v39  ;;  %v1217_v35 = vand.u32 2147483647, %v1177_v47  ;;  %vm1215_vm15 = vmor %vm1213_vm14, %vm1214_vm13 }
 0x3dc   :  { %v1210_v52 = vsub.f32 1.0, %v1209_v4  ;;  %v1191_v11 = vsel %vm1188_vm11, %v1190_v6, %v1186_v24  ;;  %v1201_v49 = vsel %vm1200_vm10, %v2125_v32, %v1197_v19 }
 0x3dd   :  { %v1206_v14 = vsel %vm1203_vm12, %v1205_v22, %v1201_v49  ;;  %v1225_v41 = vmul.f32 %v2129_v61, %v1191_v11  ;;  %vm1218_vm0 = vcmp.eq.f32.partialorder %v1217_v35, 8.507059e+37 }
 0x3de   :  { %v1224_v59 = vmul.f32 %v1206_v14, %v2695_v20  ;;  %v1211_v13 = vmul.f32 %v2127_v18, %v1210_v52  ;;  %v1237_v20 = vld [vmem:[#allocation2 + $0x14] sm:$0xf] }
 0x3e0   :  { %v2743_v43 = vadd.f32 %v1225_v41, %v1224_v59  ;;  %v1212_v40 = vadd.f32 %v2127_v18, %v1211_v13 }
 0x3e2   :  { %2130 = vtanh.f32 %v2743_v43  ;;  %v1216_v48 = vsel %vm1215_vm15, %v2127_v18, %v1212_v40 }
 0x3e3   :  { %v1221_v26 = vsel %vm1218_vm0, %v1220_v36, %v1216_v48 }
 0x3e8   :  { %v2131_v32 = vpop.eup %2130 }
 0x3e9   :  { %v1228_v42 = vmul.f32 %v2131_v32, %v1221_v26  ;;  %v2877_v26 = vld [vmem:[#allocation18_spill] sm:$0xff] }
 0x3eb   :  { %v1238_v39 = vpack.c.bf16 %v1228_v42, %v1228_v42 }
 0x3ed   :  { %1247 = vmatmul.bf16.vlgmr.msra.gmra.mxu0 %v1238_v39  ;;  %1260 = vmatmul.bf16.vlgmr.msra.gmra.mxu1 %v1238_v39 }
 0x3ee   :  { %1273 = vmatmul.bf16.vlgmr.msra.gmra.mxu2 %v1238_v39  ;;  %1286 = vmatmul.bf16.vlgmr.msra.gmra.mxu3 %v1238_v39 }
 0x3ef   :  { %1423 = vmatpush.bf16.msra.mxu0 %v2387_v3  ;;  %1436 = vmatpush.bf16.msra.mxu1 %v2389_v7 }
 0x3f0   :  { %1449 = vmatpush.bf16.msra.mxu2 %v2391_v8  ;;  %1462 = vmatpush.bf16.msra.mxu3 %v2394_v12 }
 0x3f3   :  { %1424 = vmatpush.bf16.msra.mxu0 %v2398_v16  ;;  %1437 = vmatpush.bf16.msra.mxu1 %v2400_v17 }
 0x3f4   :  { %1450 = vmatpush.bf16.msra.mxu2 %v2403_v21  ;;  %1463 = vmatpush.bf16.msra.mxu3 %v2405_v25 }
 0x3f7   :  { %1425 = vmatpush.bf16.msra.mxu0 %v2408_v29  ;;  %1438 = vmatpush.bf16.msra.mxu1 %v2412_v33 }
 0x3f8   :  { %1451 = vmatpush.bf16.msra.mxu2 %v2414_v34  ;;  %1464 = vmatpush.bf16.msra.mxu3 %v2417_v38 }
 0x3fb   :  { %1426 = vmatpush.bf16.msra.mxu0 %v2420_v44  ;;  %1439 = vmatpush.bf16.msra.mxu1 %v2424_v45 }
 0x3fc   :  { %1452 = vmatpush.bf16.msra.mxu2 %v2426_v46  ;;  %1465 = vmatpush.bf16.msra.mxu3 %v2429_v50 }
 0x3fd   :  { %1988 = vmatmul.msk.bf16.vlgmr.msrb.gmra.mxu0 %vm348_vm1, %v1237_v20  ;;  %1989 = vmatmul.msk.bf16.vlgmr.msrb.gmra.mxu1 %vm348_vm1, %v1237_v20 }
 0x3fe   :  { %1990 = vmatmul.msk.bf16.vlgmr.msrb.gmra.mxu2 %vm348_vm1, %v1237_v20  ;;  %1991 = vmatmul.msk.bf16.vlgmr.msrb.gmra.mxu3 %vm348_vm1, %v1237_v20 }
 0x3ff   :  { %1427 = vmatpush.bf16.msra.mxu0 %v2432_v56  ;;  %1440 = vmatpush.bf16.msra.mxu1 %v2436_v57 }
 0x400   :  { %1453 = vmatpush.bf16.msra.mxu2 %v2438_v58  ;;  %1466 = vmatpush.bf16.msra.mxu3 %v2441_v62 }
 0x403   :  { %1428 = vmatpush.bf16.msra.mxu0 %v2444_v5  ;;  %1441 = vmatpush.bf16.msra.mxu1 %v2448_v9 }
 0x404   :  { %1454 = vmatpush.bf16.msra.mxu2 %v2450_v10  ;;  %1467 = vmatpush.bf16.msra.mxu3 %v2453_v15 }
 0x407   :  { %1429 = vmatpush.bf16.msra.mxu0 %v2456_v27  ;;  %1442 = vmatpush.bf16.msra.mxu1 %v2460_v30 }
 0x408   :  { %1455 = vmatpush.bf16.msra.mxu2 %v2462_v31  ;;  %1468 = vmatpush.bf16.msra.mxu3 %v2465_v37 }
 0x40b   :  { %1430 = vmatpush.bf16.msra.mxu0 %v2468_v51  ;;  %1443 = vmatpush.bf16.msra.mxu1 %v2472_v53 }
 0x40c   :  { %1456 = vmatpush.bf16.msra.mxu2 %v2474_v54  ;;  %1469 = vmatpush.bf16.msra.mxu3 %v2477_v55 }
 0x40f   :  { %1485 = vmatpush.bf16.msrb.mxu0 %v2480_v60  ;;  %1498 = vmatpush.bf16.msrb.mxu1 %v2484_v63 }
 0x410   :  { %1511 = vmatpush.bf16.msrb.mxu2 %v2491_v0  ;;  %1524 = vmatpush.bf16.msrb.mxu3 %v2495_v2 }
 0x46a   :  { %v1248_v59 = vpop.f32.mrf.mxu0  ;;  %v1261_v47 = vpop.f32.mrf.mxu1 }
 0x471   :  { %v1274_v41 = vpop.f32.mrf.mxu2  ;;  %v1287_v18 = vpop.f32.mrf.mxu3 }
 0x472   :  { %v1250_v4 = vpop.f32.mrf.mxu0  ;;  %v1263_v6 = vpop.f32.mrf.mxu1 }
 0x479   :  { %v1276_v19 = vpop.f32.mrf.mxu2  ;;  %v1289_v22 = vpop.f32.mrf.mxu3 }
 0x47a   :  { %v1303_v24 = vpop.f32.mrf.mxu0  ;;  %v1316_v61 = vpop.f32.mrf.mxu1 }
 0x47b   :  { %v1304_v52 = vadd.f32 %v1303_v24, %v1248_v59  ;;  %v1317_v11 = vadd.f32 %v1316_v61, %v1261_v47 }
 0x47d   :  { %v1346_v49 = vadd.f32 %v1304_v52, %v2539_v23  ;;  %v1347_v14 = vadd.f32 %v1317_v11, %v2541_v28  ;;  %v2878_v11 = vld [vmem:[#allocation19_spill] sm:$0xff] }
 0x47f   :  { %v1992_v13 = vmul.f32 -1.442695, %v1346_v49  ;;  %v1993_v40 = vmul.f32 -1.442695, %v1347_v14 }
 0x481   :  { %2132 = vpow2.f32 %v1992_v13  ;;  %v1329_v1 = vpop.f32.mrf.mxu2  ;;  %v1342_v35 = vpop.f32.mrf.mxu3 }
 0x482   :  { %2134 = vpow2.f32 %v1993_v40  ;;  %v1330_v48 = vadd.f32 %v1329_v1, %v1274_v41  ;;  %v1305_v36 = vpop.f32.mrf.mxu0  ;;  %v1318_v32 = vpop.f32.mrf.mxu1  ;;  %v1343_v22 = vadd.f32 %v1342_v35, %v1287_v18 }
 0x484   :  { %v1348_v42 = vadd.f32 %v1330_v48, %v2877_v26  ;;  %v1349_v41 = vadd.f32 %v1343_v22, %v2878_v11 }
 0x486   :  { %v1994_v39 = vmul.f32 -1.442695, %v1348_v42 }
 0x487   :  { %v2133_v20 = vpop.eup %2132 }
 0x488   :  { %v2135_v4 = vpop.eup %2134  ;;  %v1359_v59 = vadd.f32 1.0, %v2133_v20  ;;  %2136 = vpow2.f32 %v1994_v39 }
 0x489   :  { %v1360_v47 = vadd.f32 1.0, %v2135_v4  ;;  %v1331_v6 = vpop.f32.mrf.mxu2  ;;  %v1344_v19 = vpop.f32.mrf.mxu3 }
 0x48a   :  { %2138 = vrcp.f32 %v1359_v59  ;;  %v1373_v48 = vand.u32 2147483648, %v1359_v59  ;;  %v1371_v42 = vand.u32 2147483647, %v1359_v59  ;;  %vm1367_vm4 = vweird.f32 %v1359_v59 }
 0x48b   :  { %2140 = vrcp.f32 %v1360_v47  ;;  %v1388_v36 = vand.u32 2147483648, %v1360_v47  ;;  %v1386_v18 = vand.u32 2147483647, %v1360_v47  ;;  %vm1382_vm5 = vweird.f32 %v1360_v47 }
 0x48c   :  { %v1374_v6 = vor.u32 1.1754944e-38, %v1373_v48  ;;  %vm1372_vm8 = vcmp.eq.f32.partialorder %v1371_v42, 8.507059e+37 }
 0x48d   :  { %v1389_v22 = vor.u32 1.1754944e-38, %v1388_v36  ;;  %vm1387_vm9 = vcmp.eq.f32.partialorder %v1386_v18, 8.507059e+37 }
 0x48e   :  { %v2137_v24 = vpop.eup %2136 }
 0x48f   :  { %v1361_v61 = vadd.f32 1.0, %v2137_v24 }
 0x490   :  { %v2139_v52 = vpop.eup %2138 }
 0x491   :  { %v2141_v49 = vpop.eup %2140  ;;  %v1363_v14 = vmul.f32 %v2139_v52, %v1359_v59  ;;  %2142 = vrcp.f32 %v1361_v61  ;;  %vm1368_vm2 = vweird.f32 %v2139_v52  ;;  %v1403_v48 = vand.u32 2147483648, %v1361_v61 }
 0x492   :  { %v1378_v13 = vmul.f32 %v2141_v49, %v1360_v47  ;;  %2144 = vtanh.f32 %v1349_v41  ;;  %vm1383_vm3 = vweird.f32 %v2141_v49  ;;  %vm1369_vm6 = vmor %vm1367_vm4, %vm1368_vm2  ;;  %vm1397_vm11 = vweird.f32 %v1361_v61 }
 0x493   :  { %v1364_v40 = vsub.f32 1.0, %v1363_v14  ;;  %vm1384_vm7 = vmor %vm1382_vm5, %vm1383_vm3  ;;  %v1404_v42 = vor.u32 1.1754944e-38, %v1403_v48 }
 0x494   :  { %v1379_v1 = vsub.f32 1.0, %v1378_v13 }
 0x495   :  { %v1365_v32 = vmul.f32 %v2139_v52, %v1364_v40 }
 0x496   :  { %v1380_v39 = vmul.f32 %v2141_v49, %v1379_v1 }
 0x497   :  { %v2143_v35 = vpop.eup %2142  ;;  %v1366_v20 = vadd.f32 %v2139_v52, %v1365_v32 }
 0x498   :  { %v1393_v4 = vmul.f32 %v2143_v35, %v1361_v61  ;;  %v1381_v19 = vadd.f32 %v2141_v49, %v1380_v39  ;;  %v2145_v41 = vpop.eup %2144  ;;  %vm1398_vm10 = vweird.f32 %v2143_v35 }
 0x499   :  { %v1370_v24 = vsel %vm1369_vm6, %v2139_v52, %v1366_v20  ;;  %v1401_v52 = vand.u32 2147483647, %v1361_v61  ;;  %vm1399_vm12 = vmor %vm1397_vm11, %vm1398_vm10 }
 0x49a   :  { %v1394_v14 = vsub.f32 1.0, %v1393_v4  ;;  %v1375_v13 = vsel %vm1372_vm8, %v1374_v6, %v1370_v24  ;;  %v1385_v40 = vsel %vm1384_vm7, %v2141_v49, %v1381_v19 }
 0x49b   :  { %v1390_v1 = vsel %vm1387_vm9, %v1389_v22, %v1385_v40  ;;  %v1409_v11 = vmul.f32 %v2145_v41, %v1375_v13  ;;  %vm1402_vm13 = vcmp.eq.f32.partialorder %v1401_v52, 8.507059e+37 }
 0x49c   :  { %v1395_v26 = vmul.f32 %v2143_v35, %v1394_v14  ;;  %v1408_v32 = vmul.f32 %v1390_v1, %v2743_v43 }
 0x49e   :  { %v2791_v59 = vadd.f32 %v1409_v11, %v1408_v32  ;;  %v1396_v47 = vadd.f32 %v2143_v35, %v1395_v26 }
 0x4a0   :  { %2146 = vtanh.f32 %v2791_v59  ;;  %v1400_v36 = vsel %vm1399_vm12, %v2143_v35, %v1396_v47 }
 0x4a1   :  { %v1405_v39 = vsel %vm1402_vm13, %v1404_v42, %v1400_v36 }
 0x4a6   :  { %v2147_v49 = vpop.eup %2146 }
 0x4a7   :  { %v1412_v18 = vmul.f32 %v2147_v49, %v1405_v39 }
 0x4a9   :  { %v1422_v20 = vpack.c.bf16 %v1412_v18, %v1412_v18 }
 0x4ab   :  { %1431 = vmatmul.bf16.vlgmr.msra.gmra.mxu0 %v1422_v20  ;;  %1444 = vmatmul.bf16.vlgmr.msra.gmra.mxu1 %v1422_v20 }
 0x4ac   :  { %1457 = vmatmul.bf16.vlgmr.msra.gmra.mxu2 %v1422_v20  ;;  %1470 = vmatmul.bf16.vlgmr.msra.gmra.mxu3 %v1422_v20 }
 0x4ad   :  { %1607 = vmatpush.bf16.msra.mxu0 %v2387_v3  ;;  %1620 = vmatpush.bf16.msra.mxu1 %v2389_v7  ;;  %v1421_v3 = vld [vmem:[#allocation2 + $0x18] sm:$0xf] }
 0x4ae   :  { %1633 = vmatpush.bf16.msra.mxu2 %v2391_v8  ;;  %1646 = vmatpush.bf16.msra.mxu3 %v2394_v12 }
 0x4b1   :  { %1608 = vmatpush.bf16.msra.mxu0 %v2398_v16  ;;  %1621 = vmatpush.bf16.msra.mxu1 %v2400_v17 }
 0x4b2   :  { %1634 = vmatpush.bf16.msra.mxu2 %v2403_v21  ;;  %1647 = vmatpush.bf16.msra.mxu3 %v2405_v25 }
 0x4b5   :  { %1609 = vmatpush.bf16.msra.mxu0 %v2408_v29  ;;  %1622 = vmatpush.bf16.msra.mxu1 %v2412_v33 }
 0x4b6   :  { %1635 = vmatpush.bf16.msra.mxu2 %v2414_v34  ;;  %1648 = vmatpush.bf16.msra.mxu3 %v2417_v38 }
 0x4b9   :  { %1610 = vmatpush.bf16.msra.mxu0 %v2420_v44  ;;  %1623 = vmatpush.bf16.msra.mxu1 %v2424_v45 }
 0x4ba   :  { %1636 = vmatpush.bf16.msra.mxu2 %v2426_v46  ;;  %1649 = vmatpush.bf16.msra.mxu3 %v2429_v50 }
 0x4bb   :  { %1995 = vmatmul.msk.bf16.vlgmr.msrb.gmra.mxu0 %vm348_vm1, %v1421_v3  ;;  %1996 = vmatmul.msk.bf16.vlgmr.msrb.gmra.mxu1 %vm348_vm1, %v1421_v3 }
 0x4bc   :  { %1997 = vmatmul.msk.bf16.vlgmr.msrb.gmra.mxu2 %vm348_vm1, %v1421_v3  ;;  %1998 = vmatmul.msk.bf16.vlgmr.msrb.gmra.mxu3 %vm348_vm1, %v1421_v3 }
 0x4bd   :  { %1611 = vmatpush.bf16.msra.mxu0 %v2432_v56  ;;  %1624 = vmatpush.bf16.msra.mxu1 %v2436_v57 }
 0x4be   :  { %1637 = vmatpush.bf16.msra.mxu2 %v2438_v58  ;;  %1650 = vmatpush.bf16.msra.mxu3 %v2441_v62 }
 0x4c1   :  { %1612 = vmatpush.bf16.msra.mxu0 %v2444_v5  ;;  %1625 = vmatpush.bf16.msra.mxu1 %v2448_v9 }
 0x4c2   :  { %1638 = vmatpush.bf16.msra.mxu2 %v2450_v10  ;;  %1651 = vmatpush.bf16.msra.mxu3 %v2453_v15  ;;  %v2879_v10 = vld [vmem:[#allocation18_spill] sm:$0xff] }
 0x4c5   :  { %1613 = vmatpush.bf16.msra.mxu0 %v2456_v27  ;;  %1626 = vmatpush.bf16.msra.mxu1 %v2460_v30 }
 0x4c6   :  { %1639 = vmatpush.bf16.msra.mxu2 %v2462_v31  ;;  %1652 = vmatpush.bf16.msra.mxu3 %v2465_v37 }
 0x4c9   :  { %1614 = vmatpush.bf16.msra.mxu0 %v2468_v51  ;;  %1627 = vmatpush.bf16.msra.mxu1 %v2472_v53 }
 0x4ca   :  { %1640 = vmatpush.bf16.msra.mxu2 %v2474_v54  ;;  %1653 = vmatpush.bf16.msra.mxu3 %v2477_v55 }
 0x4cd   :  { %1669 = vmatpush.bf16.msrb.mxu0 %v2480_v60  ;;  %1682 = vmatpush.bf16.msrb.mxu1 %v2484_v63 }
 0x4ce   :  { %1695 = vmatpush.bf16.msrb.mxu2 %v2491_v0  ;;  %1708 = vmatpush.bf16.msrb.mxu3 %v2495_v2  ;;  %v2880_v2 = vld [vmem:[#allocation19_spill] sm:$0xff] }
 0x528   :  { %v1432_v7 = vpop.f32.mrf.mxu0  ;;  %v1445_v8 = vpop.f32.mrf.mxu1 }
 0x52f   :  { %v1458_v12 = vpop.f32.mrf.mxu2  ;;  %v1471_v16 = vpop.f32.mrf.mxu3 }
 0x530   :  { %v1434_v17 = vpop.f32.mrf.mxu0  ;;  %v1447_v21 = vpop.f32.mrf.mxu1 }
 0x537   :  { %v1460_v25 = vpop.f32.mrf.mxu2  ;;  %v1473_v29 = vpop.f32.mrf.mxu3 }
 0x538   :  { %v1487_v33 = vpop.f32.mrf.mxu0  ;;  %v1500_v34 = vpop.f32.mrf.mxu1 }
 0x539   :  { %v1488_v38 = vadd.f32 %v1487_v33, %v1432_v7  ;;  %v1501_v44 = vadd.f32 %v1500_v34, %v1445_v8 }
 0x53b   :  { %v1530_v45 = vadd.f32 %v1488_v38, %v2539_v23  ;;  %v1531_v46 = vadd.f32 %v1501_v44, %v2541_v28 }
 0x53d   :  { %v1999_v50 = vmul.f32 -1.442695, %v1530_v45  ;;  %v2000_v56 = vmul.f32 -1.442695, %v1531_v46 }
 0x53f   :  { %2148 = vpow2.f32 %v1999_v50  ;;  %v1513_v57 = vpop.f32.mrf.mxu2  ;;  %v1526_v58 = vpop.f32.mrf.mxu3 }
 0x540   :  { %2150 = vpow2.f32 %v2000_v56  ;;  %v1514_v62 = vadd.f32 %v1513_v57, %v1458_v12  ;;  %v1489_v5 = vpop.f32.mrf.mxu0  ;;  %v1502_v9 = vpop.f32.mrf.mxu1  ;;  %v1527_v55 = vadd.f32 %v1526_v58, %v1471_v16 }
 0x542   :  { %v1532_v15 = vadd.f32 %v1514_v62, %v2879_v10  ;;  %v1533_v43 = vadd.f32 %v1527_v55, %v2880_v2 }
 0x544   :  { %v2001_v27 = vmul.f32 -1.442695, %v1532_v15 }
 0x545   :  { %v2149_v30 = vpop.eup %2148 }
 0x546   :  { %v2151_v31 = vpop.eup %2150  ;;  %v1543_v37 = vadd.f32 1.0, %v2149_v30  ;;  %2152 = vpow2.f32 %v2001_v27 }
 0x547   :  { %v1544_v51 = vadd.f32 1.0, %v2151_v31  ;;  %v1515_v53 = vpop.f32.mrf.mxu2  ;;  %v1528_v54 = vpop.f32.mrf.mxu3 }
 0x548   :  { %2154 = vrcp.f32 %v1543_v37  ;;  %v1557_v6 = vand.u32 2147483648, %v1543_v37  ;;  %v1555_v24 = vand.u32 2147483647, %v1543_v37  ;;  %vm1551_vm0 = vweird.f32 %v1543_v37 }
 0x549   :  { %2156 = vrcp.f32 %v1544_v51  ;;  %v1572_v19 = vand.u32 2147483648, %v1544_v51  ;;  %v1570_v14 = vand.u32 2147483647, %v1544_v51  ;;  %vm1566_vm2 = vweird.f32 %v1544_v51 }
 0x54a   :  { %v1558_v32 = vor.u32 1.1754944e-38, %v1557_v6  ;;  %vm1556_vm5 = vcmp.eq.f32.partialorder %v1555_v24, 8.507059e+37 }
 0x54b   :  { %v1573_v48 = vor.u32 1.1754944e-38, %v1572_v19  ;;  %vm1571_vm6 = vcmp.eq.f32.partialorder %v1570_v14, 8.507059e+37 }
 0x54c   :  { %v2153_v60 = vpop.eup %2152 }
 0x54d   :  { %v1545_v63 = vadd.f32 1.0, %v2153_v60 }
 0x54e   :  { %v2155_v0 = vpop.eup %2154 }
 0x54f   :  { %v2157_v26 = vpop.eup %2156  ;;  %v1547_v61 = vmul.f32 %v2155_v0, %v1543_v37  ;;  %2158 = vrcp.f32 %v1545_v63  ;;  %vm1552_vm14 = vweird.f32 %v2155_v0  ;;  %v1587_v16 = vand.u32 2147483648, %v1545_v63 }
 0x550   :  { %v1562_v11 = vmul.f32 %v2157_v26, %v1544_v51  ;;  %2160 = vtanh.f32 %v1533_v43  ;;  %vm1567_vm15 = vweird.f32 %v2157_v26  ;;  %vm1553_vm3 = vmor %vm1551_vm0, %vm1552_vm14  ;;  %vm1581_vm8 = vweird.f32 %v1545_v63 }
 0x551   :  { %v1548_v35 = vsub.f32 1.0, %v1547_v61  ;;  %vm1568_vm4 = vmor %vm1566_vm2, %vm1567_vm15  ;;  %v1585_v17 = vand.u32 2147483647, %v1545_v63  ;;  %v1588_v25 = vor.u32 1.1754944e-38, %v1587_v16 }
 0x552   :  { %v1563_v4 = vsub.f32 1.0, %v1562_v11 }
 0x553   :  { %v1549_v22 = vmul.f32 %v2155_v0, %v1548_v35  ;;  %vm1586_vm10 = vcmp.eq.f32.partialorder %v1585_v17, 8.507059e+37 }
 0x554   :  { %v1564_v41 = vmul.f32 %v2157_v26, %v1563_v4 }
 0x555   :  { %v2159_v13 = vpop.eup %2158  ;;  %v1550_v40 = vadd.f32 %v2155_v0, %v1549_v22 }
 0x556   :  { %v1577_v1 = vmul.f32 %v2159_v13, %v1545_v63  ;;  %v1565_v47 = vadd.f32 %v2157_v26, %v1564_v41  ;;  %v2161_v36 = vpop.eup %2160  ;;  %vm1582_vm7 = vweird.f32 %v2159_v13 }
 0x557   :  { %v1554_v52 = vsel %vm1553_vm3, %v2155_v0, %v1550_v40  ;;  %vm1583_vm9 = vmor %vm1581_vm8, %vm1582_vm7 }
 0x558   :  { %v1578_v42 = vsub.f32 1.0, %v1577_v1  ;;  %v1559_v49 = vsel %vm1556_vm5, %v1558_v32, %v1554_v52  ;;  %v1569_v39 = vsel %vm1568_vm4, %v2157_v26, %v1565_v47 }
 0x559   :  { %v1574_v18 = vsel %vm1571_vm6, %v1573_v48, %v1569_v39  ;;  %v1593_v20 = vmul.f32 %v2161_v36, %v1559_v49 }
 0x55a   :  { %v1579_v3 = vmul.f32 %v2159_v13, %v1578_v42  ;;  %v1592_v7 = vmul.f32 %v1574_v18, %v2791_v59  ;;  %v1605_v59 = vld [vmem:[#allocation2 + $0x1c] sm:$0xf] }
 0x55c   :  { %v2839_v8 = vadd.f32 %v1593_v20, %v1592_v7  ;;  %v1580_v12 = vadd.f32 %v2159_v13, %v1579_v3 }
 0x55e   :  { %2162 = vtanh.f32 %v2839_v8  ;;  %v1584_v21 = vsel %vm1583_vm9, %v2159_v13, %v1580_v12 }
 0x55f   :  { %v1589_v33 = vsel %vm1586_vm10, %v1588_v25, %v1584_v21 }
 0x564   :  { %v2163_v29 = vpop.eup %2162 }
 0x565   :  { %v1596_v34 = vmul.f32 %v2163_v29, %v1589_v33 }
 0x567   :  { %v1606_v38 = vpack.c.bf16 %v1596_v34, %v1596_v34 }
 0x569   :  { %1615 = vmatmul.bf16.vlgmr.msra.gmra.mxu0 %v1606_v38  ;;  %1628 = vmatmul.bf16.vlgmr.msra.gmra.mxu1 %v1606_v38 }
 0x56a   :  { %1641 = vmatmul.bf16.vlgmr.msra.gmra.mxu2 %v1606_v38  ;;  %1654 = vmatmul.bf16.vlgmr.msra.gmra.mxu3 %v1606_v38 }
 0x579   :  { %2002 = vmatmul.msk.bf16.vlgmr.msrb.gmra.mxu0 %vm348_vm1, %v1605_v59  ;;  %2003 = vmatmul.msk.bf16.vlgmr.msrb.gmra.mxu1 %vm348_vm1, %v1605_v59 }
 0x57a   :  { %2004 = vmatmul.msk.bf16.vlgmr.msrb.gmra.mxu2 %vm348_vm1, %v1605_v59  ;;  %2005 = vmatmul.msk.bf16.vlgmr.msrb.gmra.mxu3 %vm348_vm1, %v1605_v59 }
 0x5e6   :  { %v1616_v44 = vpop.f32.mrf.mxu0  ;;  %v1629_v45 = vpop.f32.mrf.mxu1 }
 0x5ed   :  { %v1642_v46 = vpop.f32.mrf.mxu2  ;;  %v1655_v50 = vpop.f32.mrf.mxu3 }
 0x5ee   :  { %v1618_v56 = vpop.f32.mrf.mxu0  ;;  %v1631_v57 = vpop.f32.mrf.mxu1 }
 0x5f5   :  { %v1644_v58 = vpop.f32.mrf.mxu2  ;;  %v1657_v62 = vpop.f32.mrf.mxu3 }
 0x5f6   :  { %v1671_v5 = vpop.f32.mrf.mxu0  ;;  %v1684_v9 = vpop.f32.mrf.mxu1 }
 0x5f7   :  { %v1672_v15 = vadd.f32 %v1671_v5, %v1616_v44  ;;  %v1685_v27 = vadd.f32 %v1684_v9, %v1629_v45 }
 0x5f9   :  { %v1714_v30 = vadd.f32 %v1672_v15, %v2539_v23  ;;  %v1715_v31 = vadd.f32 %v1685_v27, %v2541_v28 }
 0x5fb   :  { %v2006_v37 = vmul.f32 -1.442695, %v1714_v30  ;;  %v2007_v51 = vmul.f32 -1.442695, %v1715_v31 }
 0x5fd   :  { %2164 = vpow2.f32 %v2006_v37  ;;  %v1697_v53 = vpop.f32.mrf.mxu2  ;;  %v1710_v54 = vpop.f32.mrf.mxu3 }
 0x5fe   :  { %2166 = vpow2.f32 %v2007_v51  ;;  %v1698_v55 = vadd.f32 %v1697_v53, %v1642_v46  ;;  %v1673_v60 = vpop.f32.mrf.mxu0  ;;  %v1686_v63 = vpop.f32.mrf.mxu1  ;;  %v1711_v28 = vadd.f32 %v1710_v54, %v1655_v50 }
 0x600   :  { %v1716_v0 = vadd.f32 %v1698_v55, %v2879_v10  ;;  %v1717_v24 = vadd.f32 %v1711_v28, %v2880_v2 }
 0x602   :  { %v2008_v43 = vmul.f32 -1.442695, %v1716_v0 }
 0x603   :  { %v2165_v26 = vpop.eup %2164 }
 0x604   :  { %v2167_v61 = vpop.eup %2166  ;;  %v1727_v11 = vadd.f32 1.0, %v2165_v26  ;;  %2168 = vpow2.f32 %v2008_v43 }
 0x605   :  { %v1728_v35 = vadd.f32 1.0, %v2167_v61  ;;  %v1699_v23 = vpop.f32.mrf.mxu2  ;;  %v1712_v4 = vpop.f32.mrf.mxu3 }
 0x606   :  { %2170 = vrcp.f32 %v1727_v11  ;;  %v1741_v1 = vand.u32 2147483648, %v1727_v11  ;;  %v1739_v48 = vand.u32 2147483647, %v1727_v11  ;;  %vm1735_vm12 = vweird.f32 %v1727_v11 }
 0x607   :  { %2172 = vrcp.f32 %v1728_v35  ;;  %v1756_v32 = vand.u32 2147483648, %v1728_v35  ;;  %v1754_v36 = vand.u32 2147483647, %v1728_v35  ;;  %vm1750_vm13 = vweird.f32 %v1728_v35 }
 0x608   :  { %v1742_v39 = vor.u32 1.1754944e-38, %v1741_v1  ;;  %vm1740_vm0 = vcmp.eq.f32.partialorder %v1739_v48, 8.507059e+37 }
 0x609   :  { %v1757_v20 = vor.u32 1.1754944e-38, %v1756_v32  ;;  %vm1755_vm2 = vcmp.eq.f32.partialorder %v1754_v36, 8.507059e+37 }
 0x60a   :  { %v2169_v6 = vpop.eup %2168 }
 0x60b   :  { %v1729_v19 = vadd.f32 1.0, %v2169_v6 }
 0x60c   :  { %v2171_v22 = vpop.eup %2170 }
 0x60d   :  { %v2173_v41 = vpop.eup %2172  ;;  %v1731_v14 = vmul.f32 %v2171_v22, %v1727_v11  ;;  %2174 = vrcp.f32 %v1729_v19  ;;  %vm1736_vm1 = vweird.f32 %v2171_v22  ;;  %v1771_v59 = vand.u32 2147483648, %v1729_v19 }
 0x60e   :  { %v1746_v10 = vmul.f32 %v2173_v41, %v1728_v35  ;;  %2176 = vtanh.f32 %v1717_v24  ;;  %vm1751_vm11 = vweird.f32 %v2173_v41  ;;  %vm1737_vm14 = vmor %vm1735_vm12, %vm1736_vm1  ;;  %vm1765_vm4 = vweird.f32 %v1729_v19 }
 0x60f   :  { %v1732_v13 = vsub.f32 1.0, %v1731_v14  ;;  %vm1752_vm15 = vmor %vm1750_vm13, %vm1751_vm11  ;;  %v1769_v44 = vand.u32 2147483647, %v1729_v19  ;;  %v1772_v46 = vor.u32 1.1754944e-38, %v1771_v59 }
 0x610   :  { %v1747_v40 = vsub.f32 1.0, %v1746_v10 }
 0x611   :  { %v1733_v47 = vmul.f32 %v2171_v22, %v1732_v13  ;;  %vm1770_vm6 = vcmp.eq.f32.partialorder %v1769_v44, 8.507059e+37 }
 0x612   :  { %v1748_v52 = vmul.f32 %v2173_v41, %v1747_v40 }
 0x613   :  { %v2175_v42 = vpop.eup %2174  ;;  %v1734_v49 = vadd.f32 %v2171_v22, %v1733_v47 }
 0x614   :  { %v1761_v2 = vmul.f32 %v2175_v42, %v1729_v19  ;;  %v1749_v18 = vadd.f32 %v2173_v41, %v1748_v52  ;;  %v2177_v7 = vpop.eup %2176  ;;  %vm1766_vm3 = vweird.f32 %v2175_v42 }
 0x615   :  { %v1738_v3 = vsel %vm1737_vm14, %v2171_v22, %v1734_v49  ;;  %vm1767_vm5 = vmor %vm1765_vm4, %vm1766_vm3 }
 0x616   :  { %v1762_v12 = vsub.f32 1.0, %v1761_v2  ;;  %v1743_v16 = vsel %vm1740_vm0, %v1742_v39, %v1738_v3  ;;  %v1753_v17 = vsel %vm1752_vm15, %v2173_v41, %v1749_v18 }
 0x617   :  { %v1758_v21 = vsel %vm1755_vm2, %v1757_v20, %v1753_v17  ;;  %v1777_v25 = vmul.f32 %v2177_v7, %v1743_v16 }
 0x618   :  { %v1763_v29 = vmul.f32 %v2175_v42, %v1762_v12  ;;  %v1776_v33 = vmul.f32 %v1758_v21, %v2839_v8 }
 0x61a   :  { %v1778_v34 = vadd.f32 %v1777_v25, %v1776_v33  ;;  %v1764_v38 = vadd.f32 %v2175_v42, %v1763_v29 }
 0x61c   :  { %2178 = vtanh.f32 %v1778_v34  ;;  %1789 = vst [vmem:[#allocation11] sm:$0xff] %v1778_v34  ;;  %v1768_v45 = vsel %vm1767_vm5, %v2175_v42, %v1764_v38 }
 0x61d   :  { %1811 = dma.vmem_to_hbm [thread:$0]  %s1807_s3, 128, %s1809_s17, [#allocation12]   ;;  %v1773_v50 = vsel %vm1770_vm6, %v1772_v46, %v1768_v45 }
 0x622   :  { %v2179_v8 = vpop.eup %2178 }
 0x623   :  { %v1780_v56 = vmul.f32 %v2179_v8, %v1773_v50 }
 0x625   :  { %1788 = vst [vmem:[#allocation10] sm:$0xff] %v1780_v56 }
 0x626   :  { %1800 = dma.vmem_to_hbm [thread:$0]  %s1796_s19, 128, %s1798_s21, [#allocation4]  }
 0x627   :  { %2330 = dma.done.wait [#allocation4], 128  }
 0x628   :  { %2331 = vsyncadd [#allocation4], 4294967168 }
 0x629   :  { %2332 = dma.done.wait [#allocation12], 128  }
 0x62a   :  { %2333 = vsyncadd [#allocation12], 4294967168 }
 0x62b   :  { %1820 = vsyncpa [#allocation3], 1 }
 0x62c   :  { %1821 = vsyncpa [#allocation6], 1 }
 0x62d   :  { %1822 = vsyncpa [#allocation9], 1 }
 0x62e   :  { %1823 = vsyncpa [#allocation4], 1 }
 0x62f   :  { %1824 = vsyncpa [#allocation12], 1 }

</bundles_post_ra>
